<compile_context>
chip_gen: v7x
topology: tpu7x:2x2x1
jax: 0.10.0
libtpu: 0.0.40
codegen_flags: <defaults>
</compile_context>

<pallas_src>
import functools

import jax
import jax.numpy as jnp
from jax.experimental import pallas as pl
from jax.experimental.pallas import tpu as pltpu


def _round_up(x, m):
    return (x + m - 1) // m * m


def _cdiv(a, b):
    return -(-a // b)


def _conv2d_row_tile_kernel(x_ref, w_ref, o_ref, patch_ref, *,
                            TH, KH, KW, Wo_pad, Cin, Cout):
    # x_ref:     (1, Hp, Wp, Cin)       bf16  per-batch strip, resident across row tiles
    # w_ref:     (KKC, Cpad)            bf16  im2col'd weight, resident for whole grid
    # o_ref:     (1, TH, Wo_pad, Cout)  f32   output row tile (only real channels -> HBM)
    # patch_ref: (TH*Wo_pad, KKC)       bf16  VMEM scratch holding the flat im2col tile
    M = TH * Wo_pad
    row0 = pl.program_id(1) * TH
    if TH % 8 == 0:
        row0 = pl.multiple_of(row0, 8)      # aligned sublane loads for the halo slices

    # im2col into a flat (M, KKC) scratch.  Wo_pad is a multiple of 8, so the
    # (TH, Wo_pad, Cin) -> (M, Cin) collapse is a pure re-indexing (no relayout) and
    # the whole contraction becomes ONE 2-D MXU matmul (M x KKC) @ (KKC x Cpad).
    for kh in range(KH):
        band = x_ref[0, pl.ds(row0 + kh, TH), :, :]               # (TH, Wp, Cin)
        for kw in range(KW):
            c0 = (kh * KW + kw) * Cin
            patch_ref[:, c0:c0 + Cin] = (
                band[:, kw:kw + Wo_pad, :].reshape(M, Cin))
            # TODO(synk): with tiny Cin these stores are still lane-masked; a fully
            # unmasked im2col would need Cin padded to 128 per tap (wasteful here).

    acc = jnp.dot(patch_ref[...], w_ref[...],
                  preferred_element_type=jnp.float32)             # (M, Cpad) f32
    # Store only the real output channels (no 128-wide f32 padding written to HBM).
    o_ref[0] = acc[:, :Cout].reshape(TH, Wo_pad, Cout).astype(o_ref.dtype)


def conv2d_pallas(x_nchw, weight_oihw, *, m_target=256):
    """Valid conv2d, stride 1, no bias. x: (N,Cin,H,W), w: (Cout,Cin,KH,KW)."""
    N, Cin, H, W = x_nchw.shape
    Cout, Cin_w, KH, KW = weight_oihw.shape
    assert Cin == Cin_w
    Ho, Wo = H - KH + 1, W - KW + 1
    assert Ho >= 1 and Wo >= 1

    LANE, SUB = 128, 8
    Wo_pad = _round_up(Wo, SUB)             # padded output columns -> clean reshapes
    Wp = Wo_pad + KW - 1                    # padded input width

    # Output-row tile: target ~m_target matmul rows per grid step (>=128 fills the
    # v5e MXU, >=256 the v6e/v7x feed).  No "TH divides Ho" requirement: cdiv grid,
    # rows padded so the last tile's halo slice stays in bounds (tail sliced off below).
    TH = max(1, _cdiv(m_target, Wo_pad))
    TH = min(TH, Ho)
    if N == 1:                              # keep >=2 parallel steps for v7x's 2 TCs
        TH = min(TH, max(1, _cdiv(Ho, 2)))
    n_row_tiles = _cdiv(Ho, TH)
    Ho_pad = n_row_tiles * TH
    Hp = Ho_pad + KH - 1

    M = TH * Wo_pad                         # matmul rows (multiple of 8 by construction)
    KKC = KH * KW * Cin                     # matmul contraction size
    Cpad = _round_up(Cout, LANE)            # MXU output lanes (computed, NOT stored)

    # Layout glue in XLA (kept only for the NCHW/OIHW PyTorch interface; an NHWC-native
    # caller could feed/consume NHWC directly and skip both transposes).
    x_nhwc = jnp.transpose(x_nchw, (0, 2, 3, 1)).astype(jnp.bfloat16)      # (N,H,W,Cin)
    x_nhwc = jnp.pad(x_nhwc, ((0, 0), (0, Hp - H), (0, Wp - W), (0, 0)))   # (N,Hp,Wp,Cin)
    w2d = jnp.transpose(weight_oihw, (2, 3, 1, 0)).reshape(KKC, Cout)      # (KKC,Cout)
    w2d = jnp.pad(w2d, ((0, 0), (0, Cpad - Cout))).astype(jnp.bfloat16)    # (KKC,Cpad)

    kernel = functools.partial(_conv2d_row_tile_kernel, TH=TH, KH=KH, KW=KW,
                               Wo_pad=Wo_pad, Cin=Cin, Cout=Cout)

    # VMEM budget: strip (double-buffered) + weight (x2) + patch scratch + out tile (x2).
    # TODO(synk): very large images need the input row-tiled with a KH-1 halo (manual
    # DMA) to stay inside v7x's 64 MiB VMEM; here the per-batch strip stays resident.
    est = (2 * Hp * Wp * Cin * 2            # input strip, double-buffered, bf16
           + 2 * KKC * Cpad * 2             # weight, bf16
           + M * KKC * 2                    # im2col scratch, bf16
           + 2 * TH * Wo_pad * Cout * 4)    # output tile, double-buffered, f32
    vmem_limit = int(min(100 * 1024 * 1024, max(32 * 1024 * 1024, 2 * est)))

    out_padded = pl.pallas_call(
        kernel,
        out_shape=jax.ShapeDtypeStruct((N, Ho_pad, Wo_pad, Cout), x_nchw.dtype),
        grid_spec=pltpu.PrefetchScalarGridSpec(
            num_scalar_prefetch=0,
            grid=(N, n_row_tiles),
            in_specs=[
                # Per-batch strip; block index ignores the row axis, so it is fetched
                # once per batch element and reused across all row tiles.
                pl.BlockSpec((1, Hp, Wp, Cin), lambda n, r: (n, 0, 0, 0)),
                # Full im2col'd, channel-padded weight matrix, resident.
                pl.BlockSpec((KKC, Cpad), lambda n, r: (0, 0)),
            ],
            # Streamed output row tile; only the real Cout channels are written.
            out_specs=pl.BlockSpec((1, TH, Wo_pad, Cout), lambda n, r: (n, r, 0, 0)),
            scratch_shapes=[pltpu.VMEM((M, KKC), jnp.bfloat16)],
        ),
        compiler_params=pltpu.CompilerParams(
            dimension_semantics=("parallel", "parallel"),   # v7x: 2 TCs share the grid
            vmem_limit_bytes=vmem_limit,
        ),
    )(x_nhwc, w2d)

    # Drop spatial padding and return PyTorch's NCHW layout.
    return jnp.transpose(out_padded[:, :Ho, :Wo, :], (0, 3, 1, 2))


def make_convolution_weight(key, in_channels, out_channels, kernel_size,
                            weight_mean=0.8, weight_std=0.05):
    """Deterministic stand-in for Convolution.reset_weight (normal init)."""
    kh, kw = (kernel_size if isinstance(kernel_size, tuple)
              else (kernel_size, kernel_size))
    w = jax.random.normal(key, (out_channels, in_channels, kh, kw), dtype=jnp.float32)
    return w * weight_std + weight_mean


if __name__ == "__main__":
    key = jax.random.PRNGKey(0)
    kx, kw_key = jax.random.split(key)

    N, Cin, H, W = 2, 4, 16, 16
    Cout, K = 8, 3

    x = jax.random.normal(kx, (N, Cin, H, W), dtype=jnp.float32)
    weight = make_convolution_weight(kw_key, Cin, Cout, K)

    conv = jax.jit(conv2d_pallas)
    out = jax.block_until_ready(conv(x, weight))
    assert out.shape == (N, Cout, H - K + 1, W - K + 1)

    # Tight check against a reference using the same bf16 rounding of the MXU inputs
    # (kernel multiplies bf16 x/w and accumulates in f32).
    xb = x.astype(jnp.bfloat16).astype(jnp.float32)
    wb = weight.astype(jnp.bfloat16).astype(jnp.float32)
    ref_bf16_in = jax.lax.conv_general_dilated(
        xb, wb, window_strides=(1, 1), padding="VALID",
        dimension_numbers=("NCHW", "OIHW", "NCHW"),
        precision=jax.lax.Precision.HIGHEST)
    assert jnp.allclose(out, ref_bf16_in, atol=1e-3, rtol=1e-3), \
        float(jnp.max(jnp.abs(out - ref_bf16_in)))

    # Loose sanity check against the full-f32 reference: bf16 MXU inputs cost ~1e-2
    # relative accuracy for this init; module semantics otherwise preserved.
    ref_f32 = jax.lax.conv_general_dilated(
        x, weight, window_strides=(1, 1), padding="VALID",
        dimension_numbers=("NCHW", "OIHW", "NCHW"),
        precision=jax.lax.Precision.HIGHEST)
    assert jnp.allclose(out, ref_f32, atol=2e-1, rtol=5e-2), \
        float(jnp.max(jnp.abs(out - ref_f32)))

    print("KERNEL_OK")
</pallas_src>

<mosaic_0001>
module attributes {stable_mosaic.version = 11 : i64} {
  func.func @_conv2d_row_tile_kernel(%arg0: i32, %arg1: i32, %arg2: memref<1x16x18x4xbf16, #tpu.memory_space<vmem>>, %arg3: memref<36x128xbf16, #tpu.memory_space<vmem>>, %arg4: memref<1x14x16x8xf32, #tpu.memory_space<vmem>>, %arg5: memref<224x36xbf16, #tpu.memory_space<vmem>>) attributes {dimension_semantics = [#tpu.dimension_semantics<parallel>, #tpu.dimension_semantics<parallel>], iteration_bounds = array<i64: 2, 1>, scalar_prefetch = 0 : i64, scratch_operands = 1 : i64, tpu.core_type = #tpu.core_type<tc>, window_params = [{transform_indices = @transform_0, window_bounds = array<i64: 1, 16, 18, 4>}, {pipeline_mode = #tpu.pipeline_mode<synchronous>, transform_indices = @transform_1, window_bounds = array<i64: 36, 128>}, {transform_indices = @transform_2, window_bounds = array<i64: 1, 14, 16, 8>}]} {
    %c14_i32 = arith.constant 14 : i32
    %0 = arith.muli %arg1, %c14_i32 : i32
    %c0_i32 = arith.constant 0 : i32
    %1 = arith.addi %0, %c0_i32 : i32
    %c0 = arith.constant 0 : index
    %2 = arith.index_cast %1 : i32 to index
    %c0_0 = arith.constant 0 : index
    %c0_1 = arith.constant 0 : index
    %3 = vector.load %arg2[%c0, %2, %c0_0, %c0_1] : memref<1x16x18x4xbf16, #tpu.memory_space<vmem>>, vector<1x14x18x4xbf16>
    %4 = vector.shape_cast %3 : vector<1x14x18x4xbf16> to vector<14x18x4xbf16>
    %5 = vector.extract_strided_slice %4 {offsets = [0, 0, 0], sizes = [14, 16, 4], strides = [1, 1, 1]} : vector<14x18x4xbf16> to vector<14x16x4xbf16>
    %6 = vector.shape_cast %5 : vector<14x16x4xbf16> to vector<224x4xbf16>
    %c0_2 = arith.constant 0 : index
    %c0_3 = arith.constant 0 : index
    %7 = vector.load %arg5[%c0_2, %c0_3] : memref<224x36xbf16, #tpu.memory_space<vmem>>, vector<224x4xbf16>
    tpu.vector_store %arg5[%c0_2, %c0_3], %6 {strides = array<i32>} : memref<224x36xbf16, #tpu.memory_space<vmem>>, vector<224x4xbf16>,
    %8 = vector.extract_strided_slice %4 {offsets = [0, 1, 0], sizes = [14, 16, 4], strides = [1, 1, 1]} : vector<14x18x4xbf16> to vector<14x16x4xbf16>
    %9 = vector.shape_cast %8 : vector<14x16x4xbf16> to vector<224x4xbf16>
    %c0_4 = arith.constant 0 : index
    %c4 = arith.constant 4 : index
    %10 = vector.load %arg5[%c0_4, %c4] : memref<224x36xbf16, #tpu.memory_space<vmem>>, vector<224x4xbf16>
    tpu.vector_store %arg5[%c0_4, %c4], %9 {strides = array<i32>} : memref<224x36xbf16, #tpu.memory_space<vmem>>, vector<224x4xbf16>,
    %11 = vector.extract_strided_slice %4 {offsets = [0, 2, 0], sizes = [14, 16, 4], strides = [1, 1, 1]} : vector<14x18x4xbf16> to vector<14x16x4xbf16>
    %12 = vector.shape_cast %11 : vector<14x16x4xbf16> to vector<224x4xbf16>
    %c0_5 = arith.constant 0 : index
    %c8 = arith.constant 8 : index
    %13 = vector.load %arg5[%c0_5, %c8] : memref<224x36xbf16, #tpu.memory_space<vmem>>, vector<224x4xbf16>
    tpu.vector_store %arg5[%c0_5, %c8], %12 {strides = array<i32>} : memref<224x36xbf16, #tpu.memory_space<vmem>>, vector<224x4xbf16>,
    %c1_i32 = arith.constant 1 : i32
    %14 = arith.addi %0, %c1_i32 : i32
    %c0_6 = arith.constant 0 : index
    %15 = arith.index_cast %14 : i32 to index
    %c0_7 = arith.constant 0 : index
    %c0_8 = arith.constant 0 : index
    %16 = vector.load %arg2[%c0_6, %15, %c0_7, %c0_8] : memref<1x16x18x4xbf16, #tpu.memory_space<vmem>>, vector<1x14x18x4xbf16>
    %17 = vector.shape_cast %16 : vector<1x14x18x4xbf16> to vector<14x18x4xbf16>
    %18 = vector.extract_strided_slice %17 {offsets = [0, 0, 0], sizes = [14, 16, 4], strides = [1, 1, 1]} : vector<14x18x4xbf16> to vector<14x16x4xbf16>
    %19 = vector.shape_cast %18 : vector<14x16x4xbf16> to vector<224x4xbf16>
    %c0_9 = arith.constant 0 : index
    %c12 = arith.constant 12 : index
    %20 = vector.load %arg5[%c0_9, %c12] : memref<224x36xbf16, #tpu.memory_space<vmem>>, vector<224x4xbf16>
    tpu.vector_store %arg5[%c0_9, %c12], %19 {strides = array<i32>} : memref<224x36xbf16, #tpu.memory_space<vmem>>, vector<224x4xbf16>,
    %21 = vector.extract_strided_slice %17 {offsets = [0, 1, 0], sizes = [14, 16, 4], strides = [1, 1, 1]} : vector<14x18x4xbf16> to vector<14x16x4xbf16>
    %22 = vector.shape_cast %21 : vector<14x16x4xbf16> to vector<224x4xbf16>
    %c0_10 = arith.constant 0 : index
    %c16 = arith.constant 16 : index
    %23 = vector.load %arg5[%c0_10, %c16] : memref<224x36xbf16, #tpu.memory_space<vmem>>, vector<224x4xbf16>
    tpu.vector_store %arg5[%c0_10, %c16], %22 {strides = array<i32>} : memref<224x36xbf16, #tpu.memory_space<vmem>>, vector<224x4xbf16>,
    %24 = vector.extract_strided_slice %17 {offsets = [0, 2, 0], sizes = [14, 16, 4], strides = [1, 1, 1]} : vector<14x18x4xbf16> to vector<14x16x4xbf16>
    %25 = vector.shape_cast %24 : vector<14x16x4xbf16> to vector<224x4xbf16>
    %c0_11 = arith.constant 0 : index
    %c20 = arith.constant 20 : index
    %26 = vector.load %arg5[%c0_11, %c20] : memref<224x36xbf16, #tpu.memory_space<vmem>>, vector<224x4xbf16>
    tpu.vector_store %arg5[%c0_11, %c20], %25 {strides = array<i32>} : memref<224x36xbf16, #tpu.memory_space<vmem>>, vector<224x4xbf16>,
    %c2_i32 = arith.constant 2 : i32
    %27 = arith.addi %0, %c2_i32 : i32
    %c0_12 = arith.constant 0 : index
    %28 = arith.index_cast %27 : i32 to index
    %c0_13 = arith.constant 0 : index
    %c0_14 = arith.constant 0 : index
    %29 = vector.load %arg2[%c0_12, %28, %c0_13, %c0_14] : memref<1x16x18x4xbf16, #tpu.memory_space<vmem>>, vector<1x14x18x4xbf16>
    %30 = vector.shape_cast %29 : vector<1x14x18x4xbf16> to vector<14x18x4xbf16>
    %31 = vector.extract_strided_slice %30 {offsets = [0, 0, 0], sizes = [14, 16, 4], strides = [1, 1, 1]} : vector<14x18x4xbf16> to vector<14x16x4xbf16>
    %32 = vector.shape_cast %31 : vector<14x16x4xbf16> to vector<224x4xbf16>
    %c0_15 = arith.constant 0 : index
    %c24 = arith.constant 24 : index
    %33 = vector.load %arg5[%c0_15, %c24] : memref<224x36xbf16, #tpu.memory_space<vmem>>, vector<224x4xbf16>
    tpu.vector_store %arg5[%c0_15, %c24], %32 {strides = array<i32>} : memref<224x36xbf16, #tpu.memory_space<vmem>>, vector<224x4xbf16>,
    %34 = vector.extract_strided_slice %30 {offsets = [0, 1, 0], sizes = [14, 16, 4], strides = [1, 1, 1]} : vector<14x18x4xbf16> to vector<14x16x4xbf16>
    %35 = vector.shape_cast %34 : vector<14x16x4xbf16> to vector<224x4xbf16>
    %c0_16 = arith.constant 0 : index
    %c28 = arith.constant 28 : index
    %36 = vector.load %arg5[%c0_16, %c28] : memref<224x36xbf16, #tpu.memory_space<vmem>>, vector<224x4xbf16>
    tpu.vector_store %arg5[%c0_16, %c28], %35 {strides = array<i32>} : memref<224x36xbf16, #tpu.memory_space<vmem>>, vector<224x4xbf16>,
    %37 = vector.extract_strided_slice %30 {offsets = [0, 2, 0], sizes = [14, 16, 4], strides = [1, 1, 1]} : vector<14x18x4xbf16> to vector<14x16x4xbf16>
    %38 = vector.shape_cast %37 : vector<14x16x4xbf16> to vector<224x4xbf16>
    %c0_17 = arith.constant 0 : index
    %c32 = arith.constant 32 : index
    %39 = vector.load %arg5[%c0_17, %c32] : memref<224x36xbf16, #tpu.memory_space<vmem>>, vector<224x4xbf16>
    tpu.vector_store %arg5[%c0_17, %c32], %38 {strides = array<i32>} : memref<224x36xbf16, #tpu.memory_space<vmem>>, vector<224x4xbf16>,
    %c0_18 = arith.constant 0 : index
    %c0_19 = arith.constant 0 : index
    %40 = vector.load %arg5[%c0_18, %c0_19] : memref<224x36xbf16, #tpu.memory_space<vmem>>, vector<224x36xbf16>
    %c0_20 = arith.constant 0 : index
    %c0_21 = arith.constant 0 : index
    %41 = vector.load %arg3[%c0_20, %c0_21] : memref<36x128xbf16, #tpu.memory_space<vmem>>, vector<36x128xbf16>
    %cst = arith.constant dense<0.000000e+00> : vector<224x128xf32>
    %42 = tpu.matmul %40, %41, %cst {dimension_numbers = #tpu.dot_dimension_numbers<[1], [0], [0], [1], [0, 0, 1, 1], [], []>} : vector<224x36xbf16>, vector<36x128xbf16>, vector<224x128xf32> -> vector<224x128xf32>
    %43 = vector.extract_strided_slice %42 {offsets = [0, 0], sizes = [224, 8], strides = [1, 1]} : vector<224x128xf32> to vector<224x8xf32>
    %44 = vector.shape_cast %43 : vector<224x8xf32> to vector<14x16x8xf32>
    %c0_22 = arith.constant 0 : index
    %c0_23 = arith.constant 0 : index
    %c0_24 = arith.constant 0 : index
    %c0_25 = arith.constant 0 : index
    %45 = vector.load %arg4[%c0_22, %c0_23, %c0_24, %c0_25] : memref<1x14x16x8xf32, #tpu.memory_space<vmem>>, vector<1x14x16x8xf32>
    %46 = vector.shape_cast %45 : vector<1x14x16x8xf32> to vector<14x16x8xf32>
    %47 = vector.shape_cast %44 : vector<14x16x8xf32> to vector<1x14x16x8xf32>
    tpu.vector_store %arg4[%c0_22, %c0_23, %c0_24, %c0_25], %47 {strides = array<i32>} : memref<1x14x16x8xf32, #tpu.memory_space<vmem>>, vector<1x14x16x8xf32>,
    return
  }
  func.func @transform_0(%arg0: i32, %arg1: i32) -> (i32, i32, i32, i32) {
    %c0_i32 = arith.constant 0 : i32
    %c0_i32_0 = arith.constant 0 : i32
    %c0_i32_1 = arith.constant 0 : i32
    %c0_i32_2 = arith.constant 0 : i32
    return %arg0, %c0_i32, %c0_i32_0, %c0_i32_1 : i32, i32, i32, i32
  }
  func.func @transform_1(%arg0: i32, %arg1: i32) -> (i32, i32) {
    %c0_i32 = arith.constant 0 : i32
    %c0_i32_0 = arith.constant 0 : i32
    %c0_i32_1 = arith.constant 0 : i32
    return %c0_i32, %c0_i32_0 : i32, i32
  }
  func.func @transform_2(%arg0: i32, %arg1: i32) -> (i32, i32, i32, i32) {
    %c0_i32 = arith.constant 0 : i32
    %c0_i32_0 = arith.constant 0 : i32
    %c0_i32_1 = arith.constant 0 : i32
    return %arg0, %arg1, %c0_i32, %c0_i32_0 : i32, i32, i32, i32
  }
}

</mosaic_0001>

<bundles_post_ra>
// kernel: conv2d_pallas.1
= control target key start
LH: loop header
LB: loop body
LE: loop exit
PB: predicated region body
PF: predicated region fallthrough
CT: control target
= control target key end

     0   :  { %s3427_s9 = smov 0   ;;  %s3429_s10 = smov 0   ;;  %s5010_s0 = inlined_call_operand.vmem [shape: bf16[2,16,18,4], index: 0, kind: input, shape index: {}]   ;;  %s5011_s1 = inlined_call_operand.vmem [shape: bf16[36,128], index: 1, kind: input, shape index: {}]   ;;  %s5012_s2 = inlined_call_operand.vmem [shape: f32[2,14,16,8], index: 2, kind: output, shape index: {}]  }
   0x1   :  { %s3431_s11 = smov 0  }
   0x2 LB: > { %s24_s12 = sadd.s32 1, %s3398_s10  ;;  %p2961_p0 = scmp.ge.s32.totalorder %s3402_s11, 1  ;;  %s3402_s11 = sphi %s3431_s11, %s12_s11   ;;  %s3398_s10 = sphi %s3429_s10, %s5018_s10   ;;  %s3394_s9 = sphi %s3427_s9, %s5017_s9  }
   0x3   : > { %p26_p1 = scmp.ge.s32.totalorder %s24_s12, 2  ;;  %p126_p2 = scmp.lt.s32.totalorder %s3402_s11, 3 }
   0x5   : > { %s5020_s12 = smov (%p26_p1, %s24_s12), 0  ;;  %p127_p3 = pnand %p2961_p0, %p126_p2 }
   0x6   : > { %p153_p4 = scmp.lt.s32.totalorder (!%p127_p3), %s3394_s9, 1  ;;  %vm767_vm0 = vcmask (!%p127_p3), 1042432   ;;  %vm768_vm1 = vcmask (!%p127_p3), 1046532   ;;  %s3404_s17 = smov (!%p127_p3), 12   ;;  %vm315_vm2 = vsmask.f32 (!%p127_p3), 3328 }
   0x7   : > { %130 = sbr.rel (%p127_p3) target bundleno = 627 (0x273), region = 28  ;;  %vm316_vm3 = vsmask.f32 (!%p127_p3), 7440  ;;  %vm3490_vm4 = vmor (!%p127_p3), %vm767_vm0, %vm768_vm1  ;;  %s3405_s18 = smov (!%p127_p3), 20   ;;  %vm300_vm6 = vcmask (!%p127_p3), 31744   ;;  %vm738_vm7 = vcmask (!%p127_p3), 64544  }
   0x8   : > { %s3406_s19 = smov (!%p127_p3), 8   ;;  %vm3526_vm5 = vmor (!%p127_p3), %vm315_vm2, %vm316_vm3  ;;  %s3407_s20 = smov (!%p127_p3), 4   ;;  %vm952_vm8 = vcmask (!%p127_p3), 97344   ;;  %vm1125_vm9 = vcmask (!%p127_p3), 130144   ;;  %vm1560_vm10 = vcmask (!%p127_p3), 162944   ;;  %vm1771_vm11 = vcmask (!%p127_p3), 195744  }
   0x9   : > { %s3408_s21 = smov (!%p127_p3), 16   ;;  %s3409_s22 = smov (!%p127_p3), 24   ;;  %vm1944_vm12 = vcmask (!%p127_p3), 228544   ;;  %vm2379_vm13 = vcmask (!%p127_p3), 261344   ;;  %vm2590_vm14 = vcmask (!%p127_p3), 294144   ;;  %vm2682_vm15 = vcmask (!%p127_p3), 1041408  }
   0xa   : > { %s3410_s23 = smov (!%p127_p3), 28   ;;  %s3411_s24 = smov (!%p127_p3), 32   ;;  %vm2639_vm0 = vcmask (!%p127_p3), 293888   ;;  %vm2831_vm1 = vcmask (!%p127_p3), 64512  }
   0xe   : > { %s5022_s9 = smov (!%p153_p4, %s3394_s9), 1 }
   0xf   : > { %s3294_s13 = smul.u32 192, %s5022_s9 }
  0x10   : > { %s3295_s3 = smul.u32 224, %s5022_s9 }
  0x11   : > { %s3451_s16 = scalar_lea.vmem %s5010_s0, %s3294_s13 }
  0x12   : > { %v3454_v0 = vld [vmem:[%s3451_s16 + $0x18] sm:$0xf]  ;;  %v3457_v1 = vld [vmem:[%s3451_s16 + $0x1c] sm:$0xf]  ;;  %v3020_v2 = vld [vmem:[%s3451_s16 + $0xc] sm:$0xf]  ;;  %s4942_s6 = scalar_lea.vmem %s5012_s2, %s3295_s3 }
  0x13   : > { %v3063_v3 = vcombine.low %v3454_v0, %v3457_v1  ;;  %v1165_v4 = vshrl.u32 %v3454_v0, 16  ;;  %v1168_v5 = vshll.u32 %v3454_v0, 16  ;;  %v1174_v6 = vshll.u32 %v3457_v1, 16  ;;  %v3466_v7 = vld [vmem:[%s3451_s16 + $0x10] sm:$0xf] }
  0x14   : > { %v1178_v8 = vshrl.u32 %v3457_v1, 16  ;;  %v3062_v9 = vcombine.low %v3020_v2, %v3466_v7  ;;  %v1141_v10 = vshrl.u32 %v3020_v2, 16  ;;  %v1144_v11 = vshll.u32 %v3020_v2, 16  ;;  %v3471_v12 = vld [vmem:[%s3451_s16 + $0x14] sm:$0x1] }
  0x15   : > { %v3473_v13 = vrot.slane %v1165_v4, 4  ;;  %v3475_v14 = vrot.slane %v1168_v5, 5  ;;  %1085 = vrot.lane.b32.xlu1 %v3063_v3, %s3404_s17  ;;  %v1150_v15 = vshll.u32 %v3466_v7, 16  ;;  %v1154_v16 = vshrl.u32 %v3466_v7, 16  ;;  %v174_v17 = vld [vmem:[%s3451_s16] sm:$0xf] }
  0x16   : > { %v3481_v18 = vrot.slane %v1178_v8, 4  ;;  %v3483_v19 = vrot.slane %v1141_v10, 4  ;;  %v3485_v20 = vrot.slane %v1144_v11, 5  ;;  %1083 = vrot.lane.b32.xlu0 %v3062_v9, %s3404_s17  ;;  %v3090_v22 = vrot.slane %v3020_v2, 9  ;;  %v175_v23 = vld [vmem:[%s3451_s16 + $0x4] sm:$0xf] }
  0x17   : > { %v3495_v24 = vrot.slane %v1154_v16, 4  ;;  %v1591_v25 = vrot.slane %v3466_v7, 5  ;;  %v1594_v26 = vrot.slane %v3471_v12, 5  ;;  %v176_v27 = vld [vmem:[%s3451_s16 + $0x8] sm:$0x1]  ;;  %v2992_v28 = vrot.slane %v174_v17, 9 }
  0x18   : > { %v772_v29 = vrot.slane %v175_v23, 5  ;;  %v775_v30 = vrot.slane %v176_v27, 5  ;;  %v177_v31 = vld [vmem:[%s3451_s16 + $0xc] sm:$0xf]  ;;  %v178_v32 = vld [vmem:[%s3451_s16 + $0x10] sm:$0xf]  ;;  %v1171_v33 = vor.u32 %v3475_v14, %v3473_v13  ;;  %v1147_v34 = vor.u32 %v3485_v20, %v3483_v19 }
  0x19   : > { %v1592_v35 = vsel %vm3490_vm4, %v3090_v22, %v1591_v25  ;;  %v1593_v36 = vrot.slane %v1591_v25, 4  ;;  %v179_v37 = vld [vmem:[%s3451_s16 + $0x14] sm:$0x1]  ;;  %v2993_v38 = vrot.slane %v177_v31, 9  ;;  %v779_v39 = vrot.slane %v178_v32, 5 }
  0x1a   : > { %v773_v40 = vsel %vm3490_vm4, %v2992_v28, %v772_v29  ;;  %v774_v41 = vrot.slane %v772_v29, 4  ;;  %v782_v42 = vrot.slane %v179_v37, 5  ;;  %v319_v43 = vshrl.u32 %v174_v17, 16  ;;  %v3025_v52 = vld [vmem:[%s3451_s16 + $0x20] sm:$0x1] }
  0x1b   : > { %v1595_v44 = vsel %vm3490_vm4, %v1593_v36, %v1594_v26  ;;  %v780_v45 = vsel %vm3490_vm4, %v2993_v38, %v779_v39  ;;  %v781_v46 = vrot.slane %v779_v39, 4  ;;  %v322_v47 = vshll.u32 %v174_v17, 16 }
  0x1c   : > { %v3104_v48 = vcombine.low %v1592_v35, %v1595_v44  ;;  %v776_v49 = vsel %vm3490_vm4, %v774_v41, %v775_v30  ;;  %v321_v50 = vrot.slane %v319_v43, 4  ;;  %v328_v51 = vshll.u32 %v175_v23, 16  ;;  %v3554_v44 = vld [vmem:[%s3451_s16 + $0x28] sm:$0xf] }
  0x1d   : > { %v3006_v53 = vcombine.low %v773_v40, %v776_v49  ;;  %v783_v54 = vsel %vm3490_vm4, %v781_v46, %v782_v42  ;;  %v324_v55 = vrot.slane %v322_v47, 5  ;;  %v332_v56 = vshrl.u32 %v175_v23, 16  ;;  %v3545_v42 = vld [vmem:[%s3451_s16 + $0x24] sm:$0xf]  ;;  %v3567_v47 = vld [vmem:[%s3451_s16 + $0x18] sm:$0xf] }
  0x1e   : > { %1729 = vrot.lane.b32.xlu0 %v3104_v48, %s3405_s18  ;;  %v3007_v57 = vcombine.low %v780_v45, %v783_v54  ;;  %v330_v58 = vrot.slane %v328_v51, 5  ;;  %v338_v59 = vshll.u32 %v176_v27, 16  ;;  %v3091_v60 = vrot.slane %v3454_v0, 9  ;;  %v3570_v48 = vld [vmem:[%s3451_s16 + $0x1c] sm:$0xf] }
  0x1f   : > { %910 = vrot.lane.b32.xlu1 %v3006_v53, %s3406_s19  ;;  %v325_v61 = vor.u32 %v324_v55, %v321_v50  ;;  %v334_v62 = vrot.slane %v332_v56, 4  ;;  %v1598_v63 = vrot.slane %v3457_v1, 5  ;;  %v1601_v2 = vrot.slane %v3025_v52, 5  ;;  %v3581_v55 = vld [vmem:[%s3451_s16 + $0x2c] sm:$0x1] }
  0x20   : > { %v340_v4 = vrot.slane %v338_v59, 5  ;;  %v343_v5 = vshrl.u32 %v177_v31, 16  ;;  %v346_v8 = vshll.u32 %v177_v31, 16  ;;  %v352_v9 = vshll.u32 %v178_v32, 16 }
  0x21   : > { %v326_v10 = vrot.slane %v325_v61, 4  ;;  %v335_v0 = vor.u32 %v334_v62, %v330_v58  ;;  %v1599_v11 = vsel %vm3490_vm4, %v3091_v60, %v1598_v63  ;;  %v1600_v13 = vrot.slane %v1598_v63, 4  ;;  %v3587_v60 = vld [vmem:[%s3451_s16 + $0x20] sm:$0x1] }
  0x22   : > { %v345_v14 = vrot.slane %v343_v5, 4  ;;  %v348_v16 = vrot.slane %v346_v8, 5  ;;  %v354_v17 = vrot.slane %v352_v9, 5  ;;  %v356_v22 = vshrl.u32 %v178_v32, 16 }
  0x23   : > { %912 = vrot.lane.b32.xlu1 %v3007_v57, %s3406_s19  ;;  %v331_v23 = vsel %vm3526_vm5, %v326_v10, %v330_v58  ;;  %v336_v25 = vrot.slane %v335_v0, 4  ;;  %v1602_v26 = vsel %vm3490_vm4, %v1600_v13, %v1601_v2  ;;  %v362_v27 = vshll.u32 %v179_v37, 16 }
  0x24   : > { %v3105_v28 = vcombine.low %v1599_v11, %v1602_v26  ;;  %v349_v29 = vor.u32 %v348_v16, %v345_v14  ;;  %v358_v30 = vrot.slane %v356_v22, 4  ;;  %v1172_v31 = vrot.slane %v1171_v33, 4  ;;  %v3600_v16 = vld [vmem:[%s3451_s16 + $0x1c] sm:$0xf] }
  0x25   : > { %v341_v35 = vsel %vm3526_vm5, %v336_v25, %v340_v4  ;;  %v364_v32 = vrot.slane %v362_v27, 5  ;;  %v1176_v36 = vrot.slane %v1174_v6, 5  ;;  %v1184_v38 = vshll.u32 %v3025_v52, 16  ;;  %v3594_v4 = vld [vmem:[%s3451_s16 + $0x18] sm:$0xf] }
  0x26   : > { %v2978_v39 = vcombine.low %v331_v23, %v341_v35  ;;  %v350_v40 = vrot.slane %v349_v29, 4  ;;  %v359_v41 = vor.u32 %v358_v30, %v354_v17  ;;  %v1148_v37 = vrot.slane %v1147_v34, 4  ;;  %v3606_v30 = vld [vmem:[%s3451_s16 + $0x20] sm:$0x1] }
  0x27   : > { %1731 = vrot.lane.b32.xlu1 %v3105_v28, %s3405_s18  ;;  %v1177_v33 = vsel %vm3526_vm5, %v1172_v31, %v1176_v36  ;;  %v1181_v1 = vor.u32 %v3481_v18, %v1176_v36  ;;  %v1186_v6 = vrot.slane %v1184_v38, 5  ;;  %v1152_v43 = vrot.slane %v1150_v15, 5 }
  0x28   : > { %696 = vrot.lane.b32.xlu0 %v2978_v39, %s3407_s20  ;;  %v355_v19 = vsel %vm3526_vm5, %v350_v40, %v354_v17  ;;  %v360_v20 = vrot.slane %v359_v41, 4  ;;  %v1160_v34 = vshll.u32 %v3471_v12, 16  ;;  %v3161_v45 = vcombine.low %v3545_v42, %v3554_v44 }
  0x29   : > { %v1182_v18 = vrot.slane %v1181_v1, 4  ;;  %v1153_v7 = vsel %vm3526_vm5, %v1148_v37, %v1152_v43  ;;  %v1157_v15 = vor.u32 %v3495_v24, %v1152_v43  ;;  %v1984_v46 = vshrl.u32 %v3545_v42, 16 }
  0x2a   : > { %v365_v12 = vsel %vm3526_vm5, %v360_v20, %v364_v32  ;;  %v1162_v49 = vrot.slane %v1160_v34, 5  ;;  %v1987_v50 = vshll.u32 %v3545_v42, 16  ;;  %v1997_v51 = vshrl.u32 %v3554_v44, 16 }
  0x2b   : > { %v2979_v52 = vcombine.low %v355_v19, %v365_v12  ;;  %v1187_v24 = vsel %vm3526_vm5, %v1182_v18, %v1186_v6  ;;  %v1158_v53 = vrot.slane %v1157_v15, 4  ;;  %v3160_v54 = vcombine.low %v3567_v47, %v3570_v48 }
  0x2c   : > { %v3077_v56 = vcombine.low %v1177_v33, %v1187_v24  ;;  %v1960_v57 = vshrl.u32 %v3567_v47, 16  ;;  %v1963_v58 = vshll.u32 %v3567_v47, 16  ;;  %v1973_v59 = vshrl.u32 %v3570_v48, 16 }
  0x2d   : > { %698 = vrot.lane.b32.xlu0 %v2979_v52, %s3407_s20  ;;  %v1163_v61 = vsel %vm3526_vm5, %v1158_v53, %v1162_v49  ;;  %v1986_v62 = vrot.slane %v1984_v46, 4  ;;  %v1989_v63 = vrot.slane %v1987_v50, 5  ;;  %v1993_v2 = vshll.u32 %v3554_v44, 16  ;;  %v3622_v46 = vld [vmem:[%s3451_s16 + $0x60] sm:$0xf] }
  0x2e   : > { %1520 = vrot.lane.b32.xlu1 %v3077_v56, %s3408_s21  ;;  %v3076_v5 = vcombine.low %v1153_v7, %v1163_v61  ;;  %v1999_v8 = vrot.slane %v1997_v51, 4  ;;  %v2003_v9 = vshll.u32 %v3581_v55, 16  ;;  %v1962_v10 = vrot.slane %v1960_v57, 4  ;;  %v3644_v61 = vld [vmem:[%s3451_s16 + $0x68] sm:$0x1] }
  0x2f   : > { %v1990_v0 = vor.u32 %v1989_v63, %v1986_v62  ;;  %v1995_v11 = vrot.slane %v1993_v2, 5  ;;  %v1965_v13 = vrot.slane %v1963_v58, 5  ;;  %v1969_v14 = vshll.u32 %v3570_v48, 16 }
  0x30   : > { %v2005_v17 = vrot.slane %v2003_v9, 5  ;;  %v1975_v22 = vrot.slane %v1973_v59, 4  ;;  %v1979_v23 = vshll.u32 %v3587_v60, 16  ;;  %v367_v25 = vshrl.u32 %v3594_v4, 16 }
  0x31   : > { %1518 = vrot.lane.b32.xlu0 %v3076_v5, %s3408_s21  ;;  %v1991_v26 = vrot.slane %v1990_v0, 4  ;;  %v2000_v27 = vor.u32 %v1999_v8, %v1995_v11  ;;  %v1966_v28 = vor.u32 %v1965_v13, %v1962_v10  ;;  %v1971_v29 = vrot.slane %v1969_v14, 5  ;;  %v3651_v5 = vld [vmem:[%s3451_s16 + $0x6c] sm:$0xf]  ;;  %v3662_v13 = vld [vmem:[%s3451_s16 + $0x74] sm:$0x1] }
  0x32   : > { %1904 = vrot.lane.b32.xlu1 %v3161_v45, %s3409_s22  ;;  %v1981_v31 = vrot.slane %v1979_v23, 5  ;;  %v369_v35 = vrot.slane %v367_v25, 4  ;;  %v370_v32 = vshll.u32 %v3594_v4, 16  ;;  %v376_v36 = vshll.u32 %v3600_v16, 16 }
  0x33   : > { %v1996_v38 = vsel %vm3526_vm5, %v1991_v26, %v1995_v11  ;;  %v2001_v39 = vrot.slane %v2000_v27, 4  ;;  %v1967_v40 = vrot.slane %v1966_v28, 4  ;;  %v1976_v41 = vor.u32 %v1975_v22, %v1971_v29  ;;  %v3659_v11 = vld [vmem:[%s3451_s16 + $0x70] sm:$0xf] }
  0x34   : > { %v372_v37 = vrot.slane %v370_v32, 5  ;;  %v378_v33 = vrot.slane %v376_v36, 5  ;;  %v380_v1 = vshrl.u32 %v3600_v16, 16  ;;  %v386_v6 = vshll.u32 %v3606_v30, 16  ;;  %v3673_v36 = vld [vmem:[%s3451_s16 + $0x24] sm:$0xf] }
  0x35   : > { %1902 = vrot.lane.b32.xlu0 %v3160_v54, %s3409_s22  ;;  %v2006_v43 = vsel %vm3526_vm5, %v2001_v39, %v2005_v17  ;;  %v1972_v19 = vsel %vm3526_vm5, %v1967_v40, %v1971_v29  ;;  %v1977_v20 = vrot.slane %v1976_v41, 4  ;;  %v3188_v34 = vrot.slane %v3567_v47, 9  ;;  %v3632_v54 = vld [vmem:[%s3451_s16 + $0x64] sm:$0xf] }
  0x36   : > { %v3175_v45 = vcombine.low %v1996_v38, %v2006_v43  ;;  %v373_v18 = vor.u32 %v372_v37, %v369_v35  ;;  %v382_v7 = vrot.slane %v380_v1, 4  ;;  %v388_v15 = vrot.slane %v386_v6, 5  ;;  %v3676_v37 = vld [vmem:[%s3451_s16 + $0x28] sm:$0xf] }
  0x37   : > { %v1982_v12 = vsel %vm3526_vm5, %v1977_v20, %v1981_v31  ;;  %v2410_v49 = vrot.slane %v3570_v48, 5  ;;  %v2413_v50 = vrot.slane %v3587_v60, 5  ;;  %v3189_v51 = vrot.slane %v3545_v42, 9 }
  0x38   : > { %2339 = vrot.lane.b32.xlu1 %v3175_v45, %s3410_s23  ;;  %v3174_v47 = vcombine.low %v1972_v19, %v1982_v12  ;;  %v374_v52 = vrot.slane %v373_v18, 4  ;;  %v383_v24 = vor.u32 %v382_v7, %v378_v33  ;;  %v2417_v53 = vrot.slane %v3554_v44, 5 }
  0x39   : > { %v2411_v56 = vsel %vm3490_vm4, %v3188_v34, %v2410_v49  ;;  %v2412_v48 = vrot.slane %v2410_v49, 4  ;;  %v2420_v57 = vrot.slane %v3581_v55, 5  ;;  %v511_v42 = vshrl.u32 %v3622_v46, 16 }
  0x3a   : > { %2337 = vrot.lane.b32.xlu0 %v3174_v47, %s3410_s23  ;;  %v379_v58 = vsel %vm3526_vm5, %v374_v52, %v378_v33  ;;  %v384_v59 = vrot.slane %v383_v24, 4  ;;  %v2418_v44 = vsel %vm3490_vm4, %v3189_v51, %v2417_v53  ;;  %v2419_v60 = vrot.slane %v2417_v53, 4  ;;  %v3349_v24 = vld [vmem:[%s5011_s1] sm:$0xff]  }
  0x3b   : > { %v2414_v62 = vsel %vm3490_vm4, %v2412_v48, %v2413_v50  ;;  %v513_v55 = vrot.slane %v511_v42, 4  ;;  %v514_v63 = vshll.u32 %v3622_v46, 16  ;;  %v520_v2 = vshll.u32 %v3632_v54, 16  ;;  %3252 = vmatprep.subr.bf16.mxu0 %v3349_v24  ;;  %3286 = vmatprep.subr.bf16.mxu1 %v3349_v24 }
  0x3c   : > { %v389_v8 = vsel %vm3526_vm5, %v384_v59, %v388_v15  ;;  %v3202_v9 = vcombine.low %v2411_v56, %v2414_v62  ;;  %v2421_v10 = vsel %vm3490_vm4, %v2419_v60, %v2420_v57  ;;  %v524_v0 = vshrl.u32 %v3632_v54, 16  ;;  %v3684_v15 = vld [vmem:[%s3451_s16 + $0x2c] sm:$0x1]  ;;  %3253 = vmatpush3.bf16.msra.mxu0 %v3349_v24  ;;  %3289 = vmatpush3.bf16.msra.mxu1 %v3349_v24 }
  0x3d   : > { %v2980_v14 = vcombine.low %v379_v58, %v389_v8  ;;  %v3203_v17 = vcombine.low %v2418_v44, %v2421_v10  ;;  %v516_v22 = vrot.slane %v514_v63, 5  ;;  %v522_v23 = vrot.slane %v520_v2, 5 }
  0x3e   : > { %2548 = vrot.lane.b32.xlu0 %v3202_v9, %s3411_s24  ;;  %v526_v25 = vrot.slane %v524_v0, 4  ;;  %v530_v26 = vshll.u32 %v3644_v61, 16  ;;  %v535_v27 = vshrl.u32 %v3651_v5, 16  ;;  %v538_v28 = vshll.u32 %v3651_v5, 16 }
  0x3f   : > { %700 = vrot.lane.b32.xlu1 %v2980_v14, %s3407_s20  ;;  %v517_v29 = vor.u32 %v516_v22, %v513_v55  ;;  %v544_v31 = vshll.u32 %v3659_v11, 16  ;;  %v548_v35 = vshrl.u32 %v3659_v11, 16  ;;  %v554_v32 = vshll.u32 %v3662_v13, 16 }
  0x40   : > { %v527_v38 = vor.u32 %v526_v25, %v522_v23  ;;  %v532_v39 = vrot.slane %v530_v26, 5  ;;  %v537_v40 = vrot.slane %v535_v27, 4  ;;  %v540_v41 = vrot.slane %v538_v28, 5  ;;  %v3722_v28 = vld [vmem:[%s3451_s16 + $0x6c] sm:$0xf] }
  0x41   : > { %v518_v33 = vrot.slane %v517_v29, 4  ;;  %v546_v1 = vrot.slane %v544_v31, 5  ;;  %v550_v6 = vrot.slane %v548_v35, 4  ;;  %v556_v43 = vrot.slane %v554_v32, 5  ;;  %v3730_v35 = vld [vmem:[%s3451_s16 + $0x24] sm:$0xf] }
  0x42   : > { %v528_v19 = vrot.slane %v527_v38, 4  ;;  %v541_v20 = vor.u32 %v540_v41, %v537_v40  ;;  %v391_v34 = vshrl.u32 %v3673_v36, 16  ;;  %v394_v45 = vshll.u32 %v3673_v36, 16  ;;  %v3738_v41 = vld [vmem:[%s3451_s16 + $0x28] sm:$0xf] }
  0x43   : > { %2550 = vrot.lane.b32.xlu1 %v3203_v17, %s3411_s24  ;;  %v523_v18 = vsel %vm3526_vm5, %v518_v33, %v522_v23  ;;  %v551_v7 = vor.u32 %v550_v6, %v546_v1  ;;  %v400_v12 = vshll.u32 %v3676_v37, 16  ;;  %v404_v49 = vshrl.u32 %v3676_v37, 16 }
  0x44   : > { %v533_v50 = vsel %vm3526_vm5, %v528_v19, %v532_v39  ;;  %v542_v51 = vrot.slane %v541_v20, 4  ;;  %v393_v47 = vrot.slane %v391_v34, 4  ;;  %v396_v52 = vrot.slane %v394_v45, 5 }
  0x45   : > { %v2986_v53 = vcombine.low %v523_v18, %v533_v50  ;;  %v552_v56 = vrot.slane %v551_v7, 4  ;;  %v402_v48 = vrot.slane %v400_v12, 5  ;;  %v406_v57 = vrot.slane %v404_v49, 4  ;;  %v3762_v12 = vld [vmem:[%s3451_s16 + $0x30] sm:$0xf] }
  0x46   : > { %v547_v42 = vsel %vm3526_vm5, %v542_v51, %v546_v1  ;;  %v397_v58 = vor.u32 %v396_v52, %v393_v47  ;;  %v410_v59 = vshll.u32 %v3684_v15, 16  ;;  %v3000_v44 = vrot.slane %v3622_v46, 9  ;;  %v3350_v46 = vld [vmem:[%s5011_s1 + $0x8] sm:$0xff]   ;;  %v3765_v49 = vld [vmem:[%s3451_s16 + $0x34] sm:$0xf] }
  0x47   : > { %712 = vrot.lane.b32.xlu0 %v2986_v53, %s3407_s20  ;;  %v557_v60 = vsel %vm3526_vm5, %v552_v56, %v556_v43  ;;  %v407_v62 = vor.u32 %v406_v57, %v402_v48  ;;  %v828_v55 = vrot.slane %v3632_v54, 5  ;;  %v831_v63 = vrot.slane %v3644_v61, 5  ;;  %3254 = vmatprep.subr.bf16.mxu0 %v3350_v46  ;;  %v3747_v43 = vld [vmem:[%s3451_s16 + $0x78] sm:$0xf]  ;;  %v3779_v57 = vld [vmem:[%s3451_s16 + $0x74] sm:$0x1] }
  0x48   : > { %v2987_v2 = vcombine.low %v547_v42, %v557_v60  ;;  %v398_v8 = vrot.slane %v397_v58, 4  ;;  %v412_v9 = vrot.slane %v410_v59, 5  ;;  %v2994_v10 = vrot.slane %v3594_v4, 9  ;;  %3255 = vmatpush3.bf16.msra.mxu0 %v3350_v46  ;;  %3287 = vmatprep.subr.bf16.mxu1 %v3350_v46  ;;  %v3787_v60 = vld [vmem:[%s3451_s16 + $0x2c] sm:$0x1] }
  0x49   : > { %v408_v0 = vrot.slane %v407_v62, 4  ;;  %v829_v14 = vsel %vm3490_vm4, %v3000_v44, %v828_v55  ;;  %v830_v54 = vrot.slane %v828_v55, 4  ;;  %v786_v61 = vrot.slane %v3600_v16, 5  ;;  %3290 = vmatpush3.bf16.msra.mxu1 %v3350_v46 }
  0x4a   : > { %714 = vrot.lane.b32.xlu1 %v2987_v2, %s3407_s20  ;;  %v403_v17 = vsel %vm3526_vm5, %v398_v8, %v402_v48  ;;  %v789_v4 = vrot.slane %v3606_v30, 5  ;;  %v3001_v22 = vrot.slane %v3651_v5, 9  ;;  %v835_v23 = vrot.slane %v3659_v11, 5  ;;  %v3725_v30 = vld [vmem:[%s3451_s16 + $0x70] sm:$0xf] }
  0x4b   : > { %v413_v25 = vsel %vm3526_vm5, %v408_v0, %v412_v9  ;;  %v832_v26 = vsel %vm3490_vm4, %v830_v54, %v831_v63  ;;  %v787_v16 = vsel %vm3490_vm4, %v2994_v10, %v786_v61  ;;  %v788_v27 = vrot.slane %v786_v61, 4 }
  0x4c   : > { %v2981_v5 = vcombine.low %v403_v17, %v413_v25  ;;  %v3014_v11 = vcombine.low %v829_v14, %v832_v26  ;;  %v836_v29 = vsel %vm3490_vm4, %v3001_v22, %v835_v23  ;;  %v837_v31 = vrot.slane %v835_v23, 4  ;;  %v3796_v23 = vld [vmem:[%s3451_s16 + $0x80] sm:$0x1] }
  0x4d   : > { %v790_v32 = vsel %vm3490_vm4, %v788_v27, %v789_v4  ;;  %v838_v38 = vrot.slane %v3662_v13, 5  ;;  %v2995_v39 = vrot.slane %v3673_v36, 9  ;;  %v793_v40 = vrot.slane %v3676_v37, 5  ;;  %v3750_v36 = vld [vmem:[%s3451_s16 + $0x7c] sm:$0xf] }
  0x4e   : > { %702 = vrot.lane.b32.xlu0 %v2981_v5, %s3407_s20  ;;  %926 = vrot.lane.b32.xlu1 %v3014_v11, %s3406_s19  ;;  %v3008_v33 = vcombine.low %v787_v16, %v790_v32  ;;  %v796_v1 = vrot.slane %v3684_v15, 5  ;;  %v3070_v6 = vcombine.low %v3722_v28, %v3725_v30  ;;  %v1333_v13 = vshrl.u32 %v3722_v28, 16 }
  0x4f   : > { %v839_v37 = vsel %vm3490_vm4, %v837_v31, %v838_v38  ;;  %v794_v19 = vsel %vm3490_vm4, %v2995_v39, %v793_v40  ;;  %v795_v20 = vrot.slane %v793_v40, 4  ;;  %v1336_v34 = vshll.u32 %v3722_v28, 16 }
  0x50   : > { %v3015_v45 = vcombine.low %v836_v29, %v839_v37  ;;  %v1346_v18 = vshrl.u32 %v3725_v30, 16  ;;  %v3064_v7 = vcombine.low %v3730_v35, %v3738_v41  ;;  %v1189_v15 = vshrl.u32 %v3730_v35, 16 }
  0x51   : > { %v797_v50 = vsel %vm3490_vm4, %v795_v20, %v796_v1  ;;  %v1192_v51 = vshll.u32 %v3730_v35, 16  ;;  %v1202_v47 = vshrl.u32 %v3738_v41, 16  ;;  %v3071_v52 = vcombine.low %v3747_v43, %v3750_v36 }
  0x52   : > { %914 = vrot.lane.b32.xlu0 %v3008_v33, %s3406_s19  ;;  %928 = vrot.lane.b32.xlu1 %v3015_v45, %s3406_s19  ;;  %v3009_v24 = vcombine.low %v794_v19, %v797_v50  ;;  %v1357_v53 = vshrl.u32 %v3747_v43, 16  ;;  %v1360_v56 = vshll.u32 %v3747_v43, 16  ;;  %v1370_v48 = vshrl.u32 %v3750_v36, 16  ;;  %v3809_v45 = vld [vmem:[%s3451_s16 + $0x38] sm:$0x1] }
  0x53   : > { %v3065_v42 = vcombine.low %v3762_v12, %v3765_v49  ;;  %v1213_v58 = vshrl.u32 %v3762_v12, 16  ;;  %v1216_v59 = vshll.u32 %v3762_v12, 16  ;;  %v1226_v44 = vshrl.u32 %v3765_v49, 16 }
  0x54   : > { %v1335_v62 = vrot.slane %v1333_v13, 4  ;;  %v1338_v55 = vrot.slane %v1336_v34, 5  ;;  %v1342_v63 = vshll.u32 %v3725_v30, 16  ;;  %v1348_v2 = vrot.slane %v1346_v18, 4 }
  0x55   : > { %v1352_v8 = vshll.u32 %v3779_v57, 16  ;;  %v1191_v9 = vrot.slane %v1189_v15, 4  ;;  %v1194_v10 = vrot.slane %v1192_v51, 5  ;;  %v1198_v46 = vshll.u32 %v3738_v41, 16 }
  0x56   : > { %916 = vrot.lane.b32.xlu0 %v3009_v24, %s3406_s19  ;;  %1099 = vrot.lane.b32.xlu1 %v3070_v6, %s3404_s17  ;;  %v1339_v0 = vor.u32 %v1338_v55, %v1335_v62  ;;  %v1344_v14 = vrot.slane %v1342_v63, 5  ;;  %v1204_v54 = vrot.slane %v1202_v47, 4  ;;  %v1208_v61 = vshll.u32 %v3787_v60, 16 }
  0x57   : > { %v1354_v17 = vrot.slane %v1352_v8, 5  ;;  %v1195_v4 = vor.u32 %v1194_v10, %v1191_v9  ;;  %v1200_v22 = vrot.slane %v1198_v46, 5  ;;  %v1359_v25 = vrot.slane %v1357_v53, 4 }
  0x58   : > { %v1340_v26 = vrot.slane %v1339_v0, 4  ;;  %v1349_v16 = vor.u32 %v1348_v2, %v1344_v14  ;;  %v1210_v27 = vrot.slane %v1208_v61, 5  ;;  %v1362_v5 = vrot.slane %v1360_v56, 5 }
  0x59   : > { %v1196_v11 = vrot.slane %v1195_v4, 4  ;;  %v1205_v29 = vor.u32 %v1204_v54, %v1200_v22  ;;  %v1366_v31 = vshll.u32 %v3750_v36, 16  ;;  %v1372_v32 = vrot.slane %v1370_v48, 4 }
  0x5a   : > { %1087 = vrot.lane.b32.xlu0 %v3064_v7, %s3404_s17  ;;  %1101 = vrot.lane.b32.xlu1 %v3071_v52, %s3404_s17  ;;  %v1345_v38 = vsel %vm3526_vm5, %v1340_v26, %v1344_v14  ;;  %v1350_v39 = vrot.slane %v1349_v16, 4  ;;  %v1363_v40 = vor.u32 %v1362_v5, %v1359_v25  ;;  %v1376_v33 = vshll.u32 %v3796_v23, 16  ;;  %v3835_v14 = vld [vmem:[%s3451_s16 + $0x78] sm:$0xf]  ;;  %v3855_v5 = vld [vmem:[%s3451_s16 + $0x34] sm:$0xf] }
  0x5b   : > { %v1201_v1 = vsel %vm3526_vm5, %v1196_v11, %v1200_v22  ;;  %v1206_v6 = vrot.slane %v1205_v29, 4  ;;  %v1368_v13 = vrot.slane %v1366_v31, 5  ;;  %v1215_v37 = vrot.slane %v1213_v58, 4  ;;  %v3844_v22 = vld [vmem:[%s3451_s16 + $0x7c] sm:$0xf] }
  0x5c   : > { %v1355_v19 = vsel %vm3526_vm5, %v1350_v39, %v1354_v17  ;;  %v1364_v20 = vrot.slane %v1363_v40, 4  ;;  %v1378_v34 = vrot.slane %v1376_v33, 5  ;;  %v1218_v18 = vrot.slane %v1216_v59, 5  ;;  %v3860_v29 = vld [vmem:[%s3451_s16 + $0x84] sm:$0xf] }
  0x5d   : > { %v3084_v7 = vcombine.low %v1345_v38, %v1355_v19  ;;  %v1211_v15 = vsel %vm3526_vm5, %v1206_v6, %v1210_v27  ;;  %v1373_v50 = vor.u32 %v1372_v32, %v1368_v13  ;;  %v1222_v51 = vshll.u32 %v3765_v49, 16  ;;  %v3852_v27 = vld [vmem:[%s3451_s16 + $0x30] sm:$0xf]  ;;  %v3868_v39 = vld [vmem:[%s3451_s16 + $0x88] sm:$0xf] }
  0x5e   : > { %1089 = vrot.lane.b32.xlu0 %v3065_v42, %s3404_s17  ;;  %v3078_v47 = vcombine.low %v1201_v1, %v1211_v15  ;;  %v1369_v52 = vsel %vm3526_vm5, %v1364_v20, %v1368_v13  ;;  %v1219_v24 = vor.u32 %v1218_v18, %v1215_v37  ;;  %v1228_v53 = vrot.slane %v1226_v44, 4  ;;  %v3879_v6 = vld [vmem:[%s3451_s16 + $0x3c] sm:$0xf]  ;;  %v3882_v13 = vld [vmem:[%s3451_s16 + $0x40] sm:$0xf] }
  0x5f   : > { %1534 = vrot.lane.b32.xlu1 %v3084_v7, %s3408_s21  ;;  %v1374_v56 = vrot.slane %v1373_v50, 4  ;;  %v1224_v48 = vrot.slane %v1222_v51, 5  ;;  %v1232_v58 = vshll.u32 %v3809_v45, 16  ;;  %v3098_v59 = vrot.slane %v3722_v28, 9 }
  0x60   : > { %v1220_v62 = vrot.slane %v1219_v24, 4  ;;  %v1647_v55 = vrot.slane %v3725_v30, 5  ;;  %v1650_v42 = vrot.slane %v3779_v57, 5  ;;  %v3092_v63 = vrot.slane %v3730_v35, 9  ;;  %v3899_v24 = vld [vmem:[%s3451_s16 + $0x80] sm:$0x1] }
  0x61   : > { %v1379_v2 = vsel %vm3526_vm5, %v1374_v56, %v1378_v34  ;;  %v1229_v44 = vor.u32 %v1228_v53, %v1224_v48  ;;  %v1234_v8 = vrot.slane %v1232_v58, 5  ;;  %v1605_v9 = vrot.slane %v3738_v41, 5 }
  0x62   : > { %1522 = vrot.lane.b32.xlu0 %v3078_v47, %s3408_s21  ;;  %v3085_v10 = vcombine.low %v1369_v52, %v1379_v2  ;;  %v1225_v28 = vsel %vm3526_vm5, %v1220_v62, %v1224_v48  ;;  %v1648_v30 = vsel %vm3490_vm4, %v3098_v59, %v1647_v55  ;;  %v1649_v57 = vrot.slane %v1647_v55, 4  ;;  %v3907_v59 = vld [vmem:[%s3451_s16 + $0x38] sm:$0x1] }
  0x63   : > { %v1230_v35 = vrot.slane %v1229_v44, 4  ;;  %v1606_v46 = vsel %vm3490_vm4, %v3092_v63, %v1605_v9  ;;  %v1607_v0 = vrot.slane %v1605_v9, 4  ;;  %v1608_v41 = vrot.slane %v3787_v60, 5 }
  0x64   : > { %1536 = vrot.lane.b32.xlu1 %v3085_v10, %s3408_s21  ;;  %v1651_v54 = vsel %vm3490_vm4, %v1649_v57, %v1650_v42  ;;  %v3099_v61 = vrot.slane %v3747_v43, 9  ;;  %v1654_v17 = vrot.slane %v3750_v36, 5  ;;  %v1657_v4 = vrot.slane %v3796_v23, 5 }
  0x65   : > { %v1235_v60 = vsel %vm3526_vm5, %v1230_v35, %v1234_v8  ;;  %v3112_v25 = vcombine.low %v1648_v30, %v1651_v54  ;;  %v1609_v26 = vsel %vm3490_vm4, %v1607_v0, %v1608_v41  ;;  %v3093_v16 = vrot.slane %v3762_v12, 9  ;;  %v3916_v41 = vld [vmem:[%s3451_s16 + $0x8c] sm:$0x1] }
  0x66   : > { %v3079_v43 = vcombine.low %v1225_v28, %v1235_v60  ;;  %v3106_v36 = vcombine.low %v1606_v46, %v1609_v26  ;;  %v1655_v23 = vsel %vm3490_vm4, %v3099_v61, %v1654_v17  ;;  %v1656_v11 = vrot.slane %v1654_v17, 4 }
  0x67   : > { %v1612_v31 = vrot.slane %v3765_v49, 5  ;;  %v1615_v32 = vrot.slane %v3809_v45, 5  ;;  %v3168_v12 = vcombine.low %v3835_v14, %v3844_v22  ;;  %v2152_v38 = vshrl.u32 %v3835_v14, 16 }
  0x68   : > { %1524 = vrot.lane.b32.xlu0 %v3079_v43, %s3408_s21  ;;  %1745 = vrot.lane.b32.xlu1 %v3112_v25, %s3405_s18  ;;  %v1658_v40 = vsel %vm3490_vm4, %v1656_v11, %v1657_v4  ;;  %v2155_v33 = vshll.u32 %v3835_v14, 16  ;;  %v2165_v49 = vshrl.u32 %v3844_v22, 16  ;;  %v3162_v1 = vcombine.low %v3852_v27, %v3855_v5 }
  0x69   : > { %v3113_v37 = vcombine.low %v1655_v23, %v1658_v40  ;;  %v1613_v19 = vsel %vm3490_vm4, %v3093_v16, %v1612_v31  ;;  %v1614_v20 = vrot.slane %v1612_v31, 4  ;;  %v2008_v34 = vshrl.u32 %v3852_v27, 16 }
  0x6a   : > { %v2011_v45 = vshll.u32 %v3852_v27, 16  ;;  %v2021_v18 = vshrl.u32 %v3855_v5, 16  ;;  %v3169_v7 = vcombine.low %v3860_v29, %v3868_v39  ;;  %v2176_v15 = vshrl.u32 %v3860_v29, 16 }
  0x6b   : > { %v1616_v50 = vsel %vm3490_vm4, %v1614_v20, %v1615_v32  ;;  %v2179_v51 = vshll.u32 %v3860_v29, 16  ;;  %v2189_v47 = vshrl.u32 %v3868_v39, 16  ;;  %v3163_v52 = vcombine.low %v3879_v6, %v3882_v13 }
  0x6c   : > { %1733 = vrot.lane.b32.xlu0 %v3106_v36, %s3405_s18  ;;  %1747 = vrot.lane.b32.xlu1 %v3113_v37, %s3405_s18  ;;  %v3107_v53 = vcombine.low %v1613_v19, %v1616_v50  ;;  %v2032_v56 = vshrl.u32 %v3879_v6, 16  ;;  %v2035_v48 = vshll.u32 %v3879_v6, 16  ;;  %v2045_v58 = vshrl.u32 %v3882_v13, 16  ;;  %v3929_v19 = vld [vmem:[%s3451_s16 + $0x44] sm:$0x1] }
  0x6d   : > { %v2154_v62 = vrot.slane %v2152_v38, 4  ;;  %v2157_v55 = vrot.slane %v2155_v33, 5  ;;  %v2161_v42 = vshll.u32 %v3844_v22, 16  ;;  %v2167_v63 = vrot.slane %v2165_v49, 4 }
  0x6e   : > { %v2171_v2 = vshll.u32 %v3899_v24, 16  ;;  %v2010_v44 = vrot.slane %v2008_v34, 4  ;;  %v2013_v8 = vrot.slane %v2011_v45, 5  ;;  %v2017_v9 = vshll.u32 %v3855_v5, 16 }
  0x6f   : > { %v2158_v10 = vor.u32 %v2157_v55, %v2154_v62  ;;  %v2163_v28 = vrot.slane %v2161_v42, 5  ;;  %v2023_v30 = vrot.slane %v2021_v18, 4  ;;  %v2027_v57 = vshll.u32 %v3907_v59, 16 }
  0x70   : > { %1735 = vrot.lane.b32.xlu0 %v3107_v53, %s3405_s18  ;;  %1918 = vrot.lane.b32.xlu1 %v3168_v12, %s3409_s22  ;;  %v2173_v35 = vrot.slane %v2171_v2, 5  ;;  %v2014_v46 = vor.u32 %v2013_v8, %v2010_v44  ;;  %v2019_v0 = vrot.slane %v2017_v9, 5  ;;  %v2178_v54 = vrot.slane %v2176_v15, 4  ;;  %v3947_v8 = vld [vmem:[%s3451_s16 + $0x78] sm:$0xf] }
  0x71   : > { %v2159_v61 = vrot.slane %v2158_v10, 4  ;;  %v2168_v17 = vor.u32 %v2167_v63, %v2163_v28  ;;  %v2029_v4 = vrot.slane %v2027_v57, 5  ;;  %v2181_v60 = vrot.slane %v2179_v51, 5  ;;  %v3950_v9 = vld [vmem:[%s3451_s16 + $0x7c] sm:$0xf] }
  0x72   : > { %v2015_v25 = vrot.slane %v2014_v46, 4  ;;  %v2024_v26 = vor.u32 %v2023_v30, %v2019_v0  ;;  %v2185_v16 = vshll.u32 %v3868_v39, 16  ;;  %v2191_v43 = vrot.slane %v2189_v47, 4  ;;  %v3961_v57 = vld [vmem:[%s3451_s16 + $0x80] sm:$0x1] }
  0x73   : > { %v2164_v36 = vsel %vm3526_vm5, %v2159_v61, %v2163_v28  ;;  %v2169_v23 = vrot.slane %v2168_v17, 4  ;;  %v2182_v11 = vor.u32 %v2181_v60, %v2178_v54  ;;  %v2195_v31 = vshll.u32 %v3916_v41, 16  ;;  %v3970_v61 = vld [vmem:[%s3451_s16 + $0x30] sm:$0xf] }
  0x74   : > { %1906 = vrot.lane.b32.xlu0 %v3162_v1, %s3409_s22  ;;  %1920 = vrot.lane.b32.xlu1 %v3169_v7, %s3409_s22  ;;  %v2020_v32 = vsel %vm3526_vm5, %v2015_v25, %v2019_v0  ;;  %v2025_v12 = vrot.slane %v2024_v26, 4  ;;  %v2187_v38 = vrot.slane %v2185_v16, 5  ;;  %v2034_v40 = vrot.slane %v2032_v56, 4  ;;  %v3978_v25 = vld [vmem:[%s3451_s16 + $0x34] sm:$0xf] }
  0x75   : > { %v2174_v33 = vsel %vm3526_vm5, %v2169_v23, %v2173_v35  ;;  %v2183_v49 = vrot.slane %v2182_v11, 4  ;;  %v2197_v37 = vrot.slane %v2195_v31, 5  ;;  %v2037_v20 = vrot.slane %v2035_v48, 5  ;;  %v3981_v23 = vld [vmem:[%s3451_s16 + $0x38] sm:$0x1] }
  0x76   : > { %v3182_v34 = vcombine.low %v2164_v36, %v2174_v33  ;;  %v2030_v1 = vsel %vm3526_vm5, %v2025_v12, %v2029_v4  ;;  %v2192_v45 = vor.u32 %v2191_v43, %v2187_v38  ;;  %v2041_v18 = vshll.u32 %v3882_v13, 16 }
  0x77   : > { %v3176_v7 = vcombine.low %v2020_v32, %v2030_v1  ;;  %v2188_v15 = vsel %vm3526_vm5, %v2183_v49, %v2187_v38  ;;  %v2038_v50 = vor.u32 %v2037_v20, %v2034_v40  ;;  %v2047_v51 = vrot.slane %v2045_v58, 4 }
  0x78   : > { %1908 = vrot.lane.b32.xlu0 %v3163_v52, %s3409_s22  ;;  %2353 = vrot.lane.b32.xlu1 %v3182_v34, %s3410_s23  ;;  %v2193_v47 = vrot.slane %v2192_v45, 4  ;;  %v2043_v53 = vrot.slane %v2041_v18, 5  ;;  %v2051_v56 = vshll.u32 %v3929_v19, 16  ;;  %v3196_v48 = vrot.slane %v3835_v14, 9 }
  0x79   : > { %v2039_v62 = vrot.slane %v2038_v50, 4  ;;  %v2466_v55 = vrot.slane %v3844_v22, 5  ;;  %v2469_v42 = vrot.slane %v3899_v24, 5  ;;  %v3190_v63 = vrot.slane %v3852_v27, 9 }
  0x7a   : > { %v2198_v58 = vsel %vm3526_vm5, %v2193_v47, %v2197_v37  ;;  %v2048_v52 = vor.u32 %v2047_v51, %v2043_v53  ;;  %v2053_v2 = vrot.slane %v2051_v56, 5  ;;  %v2424_v44 = vrot.slane %v3855_v5, 5 }
  0x7b   : > { %v3183_v14 = vcombine.low %v2188_v15, %v2198_v58  ;;  %v2044_v22 = vsel %vm3526_vm5, %v2039_v62, %v2043_v53  ;;  %v2467_v27 = vsel %vm3490_vm4, %v3196_v48, %v2466_v55  ;;  %v2468_v24 = vrot.slane %v2466_v55, 4 }
  0x7c   : > { %2341 = vrot.lane.b32.xlu0 %v3176_v7, %s3410_s23  ;;  %v2049_v10 = vrot.slane %v2048_v52, 4  ;;  %v2425_v5 = vsel %vm3490_vm4, %v3190_v63, %v2424_v44  ;;  %v2426_v28 = vrot.slane %v2424_v44, 4  ;;  %v2427_v30 = vrot.slane %v3907_v59, 5  ;;  %v4006_v52 = vld [vmem:[%s3451_s16 + $0x88] sm:$0xf] }
  0x7d   : > { %2355 = vrot.lane.b32.xlu1 %v3183_v14, %s3410_s23  ;;  %v2470_v35 = vsel %vm3490_vm4, %v2468_v24, %v2469_v42  ;;  %v559_v46 = vshrl.u32 %v3947_v8, 16  ;;  %v562_v0 = vshll.u32 %v3947_v8, 16  ;;  %v568_v54 = vshll.u32 %v3950_v9, 16  ;;  %v3998_v42 = vld [vmem:[%s3451_s16 + $0x84] sm:$0xf] }
  0x7e   : > { %v2054_v17 = vsel %vm3526_vm5, %v2049_v10, %v2053_v2  ;;  %v3210_v59 = vcombine.low %v2467_v27, %v2470_v35  ;;  %v2428_v4 = vsel %vm3490_vm4, %v2426_v28, %v2427_v30  ;;  %v572_v60 = vshrl.u32 %v3950_v9, 16 }
  0x7f   : > { %v3177_v26 = vcombine.low %v2044_v22, %v2054_v17  ;;  %v3204_v16 = vcombine.low %v2425_v5, %v2428_v4  ;;  %v561_v43 = vrot.slane %v559_v46, 4  ;;  %v564_v36 = vrot.slane %v562_v0, 5  ;;  %v4010_v22 = vld [vmem:[%s3451_s16 + $0x8c] sm:$0x1] }
  0x80   : > { %v570_v11 = vrot.slane %v568_v54, 5  ;;  %v574_v31 = vrot.slane %v572_v60, 4  ;;  %v578_v32 = vshll.u32 %v3961_v57, 16  ;;  %v415_v12 = vshrl.u32 %v3970_v61, 16 }
  0x81   : > { %2343 = vrot.lane.b32.xlu0 %v3177_v26, %s3410_s23  ;;  %2564 = vrot.lane.b32.xlu1 %v3210_v59, %s3411_s24  ;;  %v565_v38 = vor.u32 %v564_v36, %v561_v43  ;;  %v418_v40 = vshll.u32 %v3970_v61, 16  ;;  %v424_v33 = vshll.u32 %v3978_v25, 16  ;;  %v428_v49 = vshrl.u32 %v3978_v25, 16 }
  0x82   : > { %v575_v37 = vor.u32 %v574_v31, %v570_v11  ;;  %v580_v20 = vrot.slane %v578_v32, 5  ;;  %v417_v34 = vrot.slane %v415_v12, 4  ;;  %v434_v1 = vshll.u32 %v3981_v23, 16 }
  0x83   : > { %v566_v45 = vrot.slane %v565_v38, 4  ;;  %v420_v18 = vrot.slane %v418_v40, 5  ;;  %v426_v7 = vrot.slane %v424_v33, 5  ;;  %v430_v15 = vrot.slane %v428_v49, 4 }
  0x84   : > { %v576_v50 = vrot.slane %v575_v37, 4  ;;  %v436_v51 = vrot.slane %v434_v1, 5  ;;  %v3197_v47 = vrot.slane %v3860_v29, 9  ;;  %v2473_v53 = vrot.slane %v3868_v39, 5 }
  0x85   : > { %2552 = vrot.lane.b32.xlu0 %v3204_v16, %s3411_s24  ;;  %v571_v56 = vsel %vm3526_vm5, %v566_v45, %v570_v11  ;;  %v421_v48 = vor.u32 %v420_v18, %v417_v34  ;;  %v431_v62 = vor.u32 %v430_v15, %v426_v7  ;;  %v2476_v55 = vrot.slane %v3916_v41, 5  ;;  %v4040_v11 = vld [vmem:[%s3451_s16 + $0x44] sm:$0x1] }
  0x86   : > { %v581_v63 = vsel %vm3526_vm5, %v576_v50, %v580_v20  ;;  %v2474_v29 = vsel %vm3490_vm4, %v3197_v47, %v2473_v53  ;;  %v2475_v39 = vrot.slane %v2473_v53, 4  ;;  %v3191_v58 = vrot.slane %v3879_v6, 9  ;;  %v4018_v6 = vld [vmem:[%s3451_s16 + $0x3c] sm:$0xf] }
  0x87   : > { %v2988_v2 = vcombine.low %v571_v56, %v581_v63  ;;  %v422_v44 = vrot.slane %v421_v48, 4  ;;  %v432_v14 = vrot.slane %v431_v62, 4  ;;  %v2431_v41 = vrot.slane %v3882_v13, 5  ;;  %v4034_v16 = vpop.permute.xlu1 %1085 }
  0x88   : > { %v2477_v27 = vsel %vm3490_vm4, %v2475_v39, %v2476_v55  ;;  %v2434_v24 = vrot.slane %v3929_v19, 5  ;;  %v583_v10 = vshrl.u32 %v3998_v42, 16  ;;  %v586_v5 = vshll.u32 %v3998_v42, 16  ;;  %v4028_v19 = vld [vmem:[%s3451_s16 + $0x40] sm:$0xf]  ;;  %v4045_v1 = vpop.permute.xlu0 %1083 }
  0x89   : > { %716 = vrot.lane.b32.xlu1 %v2988_v2, %s3407_s20  ;;  %v427_v28 = vsel %vm3526_vm5, %v422_v44, %v426_v7  ;;  %v437_v13 = vsel %vm3526_vm5, %v432_v14, %v436_v51  ;;  %v3211_v30 = vcombine.low %v2474_v29, %v2477_v27  ;;  %v2432_v35 = vsel %vm3490_vm4, %v3191_v58, %v2431_v41 }
  0x8a   : > { %v2982_v46 = vcombine.low %v427_v28, %v437_v13  ;;  %v2433_v0 = vrot.slane %v2431_v41, 4  ;;  %v585_v54 = vrot.slane %v583_v10, 4  ;;  %v588_v17 = vrot.slane %v586_v5, 5  ;;  %v4075_v5 = vld [vmem:[%s3451_s16 + $0x84] sm:$0xf] }
  0x8b   : > { %v592_v59 = vshll.u32 %v4006_v52, 16  ;;  %v596_v4 = vshrl.u32 %v4006_v52, 16  ;;  %v602_v60 = vshll.u32 %v4010_v22, 16  ;;  %v439_v26 = vshrl.u32 %v4018_v6, 16 }
  0x8c   : > { %704 = vrot.lane.b32.xlu0 %v2982_v46, %s3407_s20  ;;  %v2435_v43 = vsel %vm3490_vm4, %v2433_v0, %v2434_v24  ;;  %v589_v36 = vor.u32 %v588_v17, %v585_v54  ;;  %v442_v31 = vshll.u32 %v4018_v6, 16  ;;  %v448_v32 = vshll.u32 %v4028_v19, 16  ;;  %v4085_v0 = vld [vmem:[%s3451_s16 + $0x88] sm:$0xf] }
  0x8d   : > { %2566 = vrot.lane.b32.xlu1 %v3211_v30, %s3411_s24  ;;  %v3205_v12 = vcombine.low %v2432_v35, %v2435_v43  ;;  %v594_v38 = vrot.slane %v592_v59, 5  ;;  %v598_v40 = vrot.slane %v596_v4, 4  ;;  %v604_v33 = vrot.slane %v602_v60, 5  ;;  %v4094_v59 = vld [vmem:[%s3451_s16 + $0x3c] sm:$0xf] }
  0x8e   : > { %v590_v49 = vrot.slane %v589_v36, 4  ;;  %v441_v37 = vrot.slane %v439_v26, 4  ;;  %v444_v20 = vrot.slane %v442_v31, 5  ;;  %v450_v34 = vrot.slane %v448_v32, 5  ;;  %v4108_v32 = vld [vmem:[%s3451_s16 + $0x90] sm:$0xf] }
  0x8f   : > { %v599_v45 = vor.u32 %v598_v40, %v594_v38  ;;  %v452_v18 = vshrl.u32 %v4028_v19, 16  ;;  %v458_v7 = vshll.u32 %v4040_v11, 16  ;;  %v3002_v15 = vrot.slane %v3947_v8, 9 }
  0x90   : > { %2554 = vrot.lane.b32.xlu0 %v3205_v12, %s3411_s24  ;;  %v595_v50 = vsel %vm3526_vm5, %v590_v49, %v594_v38  ;;  %v445_v51 = vor.u32 %v444_v20, %v441_v37  ;;  %v842_v47 = vrot.slane %v3950_v9, 5  ;;  %v845_v53 = vrot.slane %v3961_v57, 5  ;;  %v4111_v12 = vld [vmem:[%s3451_s16 + $0x94] sm:$0xf]  ;;  %v4121_v37 = vld [vmem:[%s3451_s16 + $0x48] sm:$0xf] }
  0x91   : > { %v600_v56 = vrot.slane %v599_v45, 4  ;;  %v454_v48 = vrot.slane %v452_v18, 4  ;;  %v460_v62 = vrot.slane %v458_v7, 5  ;;  %v2996_v55 = vrot.slane %v3970_v61, 9  ;;  %v4056_v63 = vpop.permute.xlu1 %910  ;;  %v4124_v20 = vld [vmem:[%s3451_s16 + $0x4c] sm:$0xf] }
  0x92   : > { %v446_v29 = vrot.slane %v445_v51, 4  ;;  %v843_v8 = vsel %vm3490_vm4, %v3002_v15, %v842_v47  ;;  %v844_v39 = vrot.slane %v842_v47, 4  ;;  %v800_v58 = vrot.slane %v3978_v25, 5  ;;  %v4071_v25 = vpop.permute.xlu0 %1729 }
  0x93   : > { %v605_v9 = vsel %vm3526_vm5, %v600_v56, %v604_v33  ;;  %v455_v2 = vor.u32 %v454_v48, %v450_v34  ;;  %v803_v57 = vrot.slane %v3981_v23, 5  ;;  %v3003_v44 = vrot.slane %v3998_v42, 9  ;;  %v4139_v48 = vld [vmem:[%s3451_s16 + $0x8c] sm:$0x1] }
  0x94   : > { %v2989_v14 = vcombine.low %v595_v50, %v605_v9  ;;  %v451_v61 = vsel %vm3526_vm5, %v446_v29, %v450_v34  ;;  %v846_v41 = vsel %vm3490_vm4, %v844_v39, %v845_v53  ;;  %v801_v27 = vsel %vm3490_vm4, %v2996_v55, %v800_v58  ;;  %v4147_v39 = vld [vmem:[%s3451_s16 + $0x44] sm:$0x1] }
  0x95   : > { %v456_v24 = vrot.slane %v455_v2, 4  ;;  %v3016_v10 = vcombine.low %v843_v8, %v846_v41  ;;  %v802_v23 = vrot.slane %v800_v58, 4  ;;  %v849_v42 = vrot.slane %v4006_v52, 5  ;;  %v4077_v28 = vpop.permute.xlu1 %912 }
  0x96   : > { %718 = vrot.lane.b32.xlu1 %v2989_v14, %s3407_s20  ;;  %v852_v13 = vrot.slane %v4010_v22, 5  ;;  %v2997_v30 = vrot.slane %v4018_v6, 9  ;;  %v807_v35 = vrot.slane %v4028_v19, 5  ;;  %v810_v46 = vrot.slane %v4040_v11, 5  ;;  %v4097_v6 = vld [vmem:[%s3451_s16 + $0x40] sm:$0xf] }
  0x97   : > { %v461_v52 = vsel %vm3526_vm5, %v456_v24, %v460_v62  ;;  %v804_v54 = vsel %vm3490_vm4, %v802_v23, %v803_v57  ;;  %v850_v17 = vsel %vm3490_vm4, %v3003_v44, %v849_v42  ;;  %v851_v22 = vrot.slane %v849_v42, 4 }
  0x98   : > { %v2983_v19 = vcombine.low %v451_v61, %v461_v52  ;;  %v3010_v4 = vcombine.low %v801_v27, %v804_v54  ;;  %v808_v60 = vsel %vm3490_vm4, %v2997_v30, %v807_v35  ;;  %v809_v26 = vrot.slane %v807_v35, 4 }
  0x99   : > { %v853_v43 = vsel %vm3490_vm4, %v851_v22, %v852_v13  ;;  %v3072_v36 = vcombine.low %v4075_v5, %v4085_v0  ;;  %v1381_v11 = vshrl.u32 %v4075_v5, 16  ;;  %v1384_v31 = vshll.u32 %v4075_v5, 16  ;;  %v4128_v45 = vpop.permute.xlu1 %1731 }
  0x9a   : > { %706 = vrot.lane.b32.xlu0 %v2983_v19, %s3407_s20  ;;  %930 = vrot.lane.b32.xlu1 %v3016_v10, %s3406_s19  ;;  %v3017_v38 = vcombine.low %v850_v17, %v853_v43  ;;  %v811_v40 = vsel %vm3490_vm4, %v809_v26, %v810_v46  ;;  %v1394_v33 = vshrl.u32 %v4085_v0, 16  ;;  %v3066_v49 = vcombine.low %v4094_v59, %v4097_v6  ;;  %v4126_v34 = vpop.permute.xlu0 %696  ;;  %v4164_v43 = vld [vmem:[%s3451_s16 + $0x98] sm:$0x1] }
  0x9b   : > { %v3011_v18 = vcombine.low %v808_v60, %v811_v40  ;;  %v1237_v7 = vshrl.u32 %v4094_v59, 16  ;;  %v1240_v15 = vshll.u32 %v4094_v59, 16  ;;  %v1250_v50 = vshrl.u32 %v4097_v6, 16  ;;  %v3361_v60 = vld [vmem:[%s3451_s16 + $0x4] sm:$0xf] }
  0x9c   : > { %v3073_v51 = vcombine.low %v4108_v32, %v4111_v12  ;;  %v1405_v47 = vshrl.u32 %v4108_v32, 16  ;;  %v1408_v53 = vshll.u32 %v4108_v32, 16  ;;  %v1418_v56 = vshrl.u32 %v4111_v12, 16 }
  0x9d   : > { %v3067_v62 = vcombine.low %v4121_v37, %v4124_v20  ;;  %v1261_v55 = vshrl.u32 %v4121_v37, 16  ;;  %v1264_v29 = vshll.u32 %v4121_v37, 16  ;;  %v1274_v8 = vshrl.u32 %v4124_v20, 16 }
  0x9e   : > { %918 = vrot.lane.b32.xlu0 %v3010_v4, %s3406_s19  ;;  %932 = vrot.lane.b32.xlu1 %v3017_v38, %s3406_s19  ;;  %v1383_v58 = vrot.slane %v1381_v11, 4  ;;  %v1386_v9 = vrot.slane %v1384_v31, 5  ;;  %v1390_v2 = vshll.u32 %v4085_v0, 16  ;;  %v1396_v57 = vrot.slane %v1394_v33, 4  ;;  %v3360_v4 = vld [vmem:[%s3451_s16] sm:$0xf] }
  0x9f   : > { %v1400_v44 = vshll.u32 %v4139_v48, 16  ;;  %v1239_v14 = vrot.slane %v1237_v7, 4  ;;  %v1242_v61 = vrot.slane %v1240_v15, 5  ;;  %v1246_v41 = vshll.u32 %v4097_v6, 16  ;;  %v4154_v27 = vpop.permute.xlu0 %698 }
  0xa0   : > { %v1387_v24 = vor.u32 %v1386_v9, %v1383_v58  ;;  %v1392_v10 = vrot.slane %v1390_v2, 5  ;;  %v1252_v23 = vrot.slane %v1250_v50, 4  ;;  %v1256_v42 = vshll.u32 %v4147_v39, 16  ;;  %v4157_v13 = vpop.permute.xlu1 %1520  ;;  %v4184_v9 = vld [vmem:[%s3451_s16 + $0x50] sm:$0x1] }
  0xa1   : > { %v1402_v30 = vrot.slane %v1400_v44, 5  ;;  %v1243_v35 = vor.u32 %v1242_v61, %v1239_v14  ;;  %v1248_v46 = vrot.slane %v1246_v41, 5  ;;  %v2964_v26 = vcombine.low %v3360_v4, %v3361_v60 }
  0xa2   : > { %920 = vrot.lane.b32.xlu0 %v3011_v18, %s3406_s19  ;;  %1103 = vrot.lane.b32.xlu1 %v3072_v36, %s3404_s17  ;;  %v1388_v52 = vrot.slane %v1387_v24, 4  ;;  %v1397_v54 = vor.u32 %v1396_v57, %v1392_v10  ;;  %v1258_v17 = vrot.slane %v1256_v42, 5  ;;  %v1407_v36 = vrot.slane %v1405_v47, 4  ;;  %v3362_v42 = vld [vmem:[%s3451_s16 + $0xc] sm:$0xf] }
  0xa3   : > { %v1244_v22 = vrot.slane %v1243_v35, 4  ;;  %v1253_v19 = vor.u32 %v1252_v23, %v1248_v46  ;;  %v4166_v11 = vpop.permute.xlu0 %1518  ;;  %v1410_v40 = vrot.slane %v1408_v53, 5  ;;  %301 = vst.msk [vmem:[#allocation2] sm:$0xff] %vm300_vm6, %v2964_v26  ;;  %v1414_v7 = vshll.u32 %v4111_v12, 16 }
  0xa4   : > { %v1393_v31 = vsel %vm3526_vm5, %v1388_v52, %v1392_v10  ;;  %v1398_v38 = vrot.slane %v1397_v54, 4  ;;  %v1420_v15 = vrot.slane %v1418_v56, 4  ;;  %v4174_v50 = vpop.permute.xlu1 %1904  ;;  %739 = vst.msk [vmem:[#allocation2] sm:$0xff] %vm738_vm7, %v4126_v34  ;;  %v1424_v53 = vshll.u32 %v4164_v43, 16 }
  0xa5   : > { %v1249_v33 = vsel %vm3526_vm5, %v1244_v22, %v1248_v46  ;;  %v1254_v18 = vrot.slane %v1253_v19, 4  ;;  %v1411_v47 = vor.u32 %v1410_v40, %v1407_v36  ;;  %v1263_v2 = vrot.slane %v1261_v55, 4  ;;  %953 = vst.msk [vmem:[#allocation2] sm:$0xff] %vm952_vm8, %v4056_v63 }
  0xa6   : > { %1091 = vrot.lane.b32.xlu0 %v3066_v49, %s3404_s17  ;;  %1105 = vrot.lane.b32.xlu1 %v3073_v51, %s3404_s17  ;;  %v1403_v58 = vsel %vm3526_vm5, %v1398_v38, %v1402_v30  ;;  %v1416_v49 = vrot.slane %v1414_v7, 5  ;;  %v1266_v51 = vrot.slane %v1264_v29, 5  ;;  %v1426_v34 = vrot.slane %v1424_v53, 5  ;;  %v3363_v30 = vld [vmem:[%s3451_s16 + $0x10] sm:$0xf]  ;;  %1126 = vst.msk [vmem:[#allocation2] sm:$0xff] %vm1125_vm9, %v4045_v1 }
  0xa7   : > { %v3086_v57 = vcombine.low %v1393_v31, %v1403_v58  ;;  %v1259_v56 = vsel %vm3526_vm5, %v1254_v18, %v1258_v17  ;;  %v1412_v14 = vrot.slane %v1411_v47, 4  ;;  %v1270_v61 = vshll.u32 %v4124_v20, 16  ;;  %v4191_v41 = vpop.permute.xlu0 %1902  ;;  %v4239_v7 = vld [vmem:[%s3451_s16 + $0x90] sm:$0xf]  ;;  %1561 = vst.msk [vmem:[#allocation2] sm:$0xff] %vm1560_vm10, %v4166_v11 }
  0xa8   : > { %v3080_v44 = vcombine.low %v1249_v33, %v1259_v56  ;;  %v1421_v24 = vor.u32 %v1420_v15, %v1416_v49  ;;  %v1267_v55 = vor.u32 %v1266_v51, %v1263_v2  ;;  %v1276_v10 = vrot.slane %v1274_v8, 4  ;;  %v4242_v15 = vld [vmem:[%s3451_s16 + $0x94] sm:$0xf]  ;;  %v4258_v56 = vld [vmem:[%s3451_s16 + $0x48] sm:$0xf]  ;;  %1772 = vst.msk [vmem:[#allocation2] sm:$0xff] %vm1771_vm11, %v4071_v25 }
  0xa9   : > { %v1280_v23 = vshll.u32 %v4184_v9, 16  ;;  %v1417_v63 = vsel %vm3526_vm5, %v1412_v14, %v1416_v49  ;;  %v1272_v29 = vrot.slane %v1270_v61, 5  ;;  %v2965_v35 = vcombine.low %v3362_v42, %v3363_v30  ;;  %v4278_v51 = vld [vmem:[%s3451_s16 + $0x9c] sm:$0xf]  ;;  %1945 = vst.msk [vmem:[#allocation2] sm:$0xff] %vm1944_vm12, %v4191_v41 }
  0xaa   : > { %1093 = vrot.lane.b32.xlu0 %v3067_v62, %s3404_s17  ;;  %1538 = vrot.lane.b32.xlu1 %v3086_v57, %s3408_s21  ;;  %v3100_v46 = vrot.slane %v4075_v5, 9  ;;  %v1422_v52 = vrot.slane %v1421_v24, 4  ;;  %v1268_v8 = vrot.slane %v1267_v55, 4  ;;  %v1661_v17 = vrot.slane %v4085_v0, 5  ;;  %v4207_v22 = vpop.permute.xlu1 %2339  ;;  %v4292_v24 = vld [vmem:[%s3451_s16 + $0x54] sm:$0xf] }
  0xab   : > { %v1282_v54 = vrot.slane %v1280_v23, 5  ;;  %v1277_v19 = vor.u32 %v1276_v10, %v1272_v29  ;;  %302 = vst.msk [vmem:[#allocation2 + $0x8] sm:$0xff] %vm300_vm6, %v2965_v35  ;;  %v1664_v62 = vrot.slane %v4139_v48, 5  ;;  %v3094_v4 = vrot.slane %v4094_v59, 9  ;;  %v4295_v55 = vld [vmem:[%s3451_s16 + $0x58] sm:$0xf] }
  0xac   : > { %v1619_v60 = vrot.slane %v4097_v6, 5  ;;  %v1427_v26 = vsel %vm3526_vm5, %v1422_v52, %v1426_v34  ;;  %v1273_v5 = vsel %vm3526_vm5, %v1268_v8, %v1272_v29  ;;  %740 = vst.msk [vmem:[#allocation2 + $0x8] sm:$0xff] %vm738_vm7, %v4154_v27  ;;  %v1662_v0 = vsel %vm3490_vm4, %v3100_v46, %v1661_v17  ;;  %v2338_v36 = vpop.permute.xlu0 %2337 }
  0xad   : > { %v1663_v31 = vrot.slane %v1661_v17, 4  ;;  %v3087_v48 = vcombine.low %v1417_v63, %v1427_v26  ;;  %v1278_v38 = vrot.slane %v1277_v19, 4  ;;  %954 = vst.msk [vmem:[#allocation2 + $0x8] sm:$0xff] %vm952_vm8, %v4077_v28  ;;  %v1622_v40 = vrot.slane %v4147_v39, 5 }
  0xae   : > { %1526 = vrot.lane.b32.xlu0 %v3080_v44, %s3408_s21  ;;  %v1620_v59 = vsel %vm3490_vm4, %v3094_v4, %v1619_v60  ;;  %v1621_v6 = vrot.slane %v1619_v60, 4  ;;  %1127 = vst.msk [vmem:[#allocation2 + $0x8] sm:$0xff] %vm1125_vm9, %v4034_v16  ;;  %v3101_v28 = vrot.slane %v4108_v32, 9  ;;  %v1668_v39 = vrot.slane %v4111_v12, 5  ;;  %v4281_v44 = vld [vmem:[%s3451_s16 + $0xa0] sm:$0xf] }
  0xaf   : > { %v1665_v27 = vsel %vm3490_vm4, %v1663_v31, %v1664_v62  ;;  %1540 = vrot.lane.b32.xlu1 %v3087_v48, %s3408_s21  ;;  %v1283_v33 = vsel %vm3526_vm5, %v1278_v38, %v1282_v54  ;;  %1562 = vst.msk [vmem:[#allocation2 + $0x8] sm:$0xff] %vm1560_vm10, %v4157_v13  ;;  %v1671_v16 = vrot.slane %v4164_v43, 5  ;;  %v3095_v1 = vrot.slane %v4121_v37, 9  ;;  %v4261_v13 = vld [vmem:[%s3451_s16 + $0x4c] sm:$0xf] }
  0xb0   : > { %v3114_v18 = vcombine.low %v1662_v0, %v1665_v27  ;;  %v3081_v58 = vcombine.low %v1273_v5, %v1283_v33  ;;  %v1623_v47 = vsel %vm3490_vm4, %v1621_v6, %v1622_v40  ;;  %v1669_v53 = vsel %vm3490_vm4, %v3101_v28, %v1668_v39  ;;  %1773 = vst.msk [vmem:[#allocation2 + $0x8] sm:$0xff] %vm1771_vm11, %v4128_v45  ;;  %v2549_v14 = vpop.permute.xlu0 %2548  ;;  %v4316_v54 = vld [vmem:[%s3451_s16 + $0x98] sm:$0x1]  ;;  %v3365_v4 = vld [vmem:[%s3451_s16 + $0x1c] sm:$0xf] }
  0xb1   : > { %v4252_v32 = vpop.permute.xlu1 %700  ;;  %v3108_v12 = vcombine.low %v1620_v59, %v1623_v47  ;;  %v1670_v2 = vrot.slane %v1668_v39, 4  ;;  %v1626_v57 = vrot.slane %v4124_v20, 5  ;;  %v1629_v43 = vrot.slane %v4184_v9, 5  ;;  %1946 = vst.msk [vmem:[#allocation2 + $0x8] sm:$0xff] %vm1944_vm12, %v4174_v50  ;;  %v3364_v62 = vld [vmem:[%s3451_s16 + $0x18] sm:$0xf] }
  0xb2   : > { %1528 = vrot.lane.b32.xlu0 %v3081_v58, %s3408_s21  ;;  %v3170_v37 = vcombine.low %v4239_v7, %v4242_v15  ;;  %v2200_v9 = vshrl.u32 %v4239_v7, 16  ;;  %v2203_v61 = vshll.u32 %v4239_v7, 16  ;;  %v2213_v45 = vshrl.u32 %v4242_v15, 16  ;;  %2381 = vst.msk [vmem:[#allocation2 + $0x8] sm:$0xff] %vm2379_vm13, %v4207_v22  ;;  %2380 = vst.msk [vmem:[#allocation2] sm:$0xff] %vm2379_vm13, %v2338_v36 }
  0xb3   : > { %1749 = vrot.lane.b32.xlu1 %v3114_v18, %s3405_s18  ;;  %v1672_v20 = vsel %vm3490_vm4, %v1670_v2, %v1671_v16  ;;  %v1627_v11 = vsel %vm3490_vm4, %v3095_v1, %v1626_v57  ;;  %v1628_v49 = vrot.slane %v1626_v57, 4  ;;  %v3164_v25 = vcombine.low %v4258_v56, %v4261_v13  ;;  %v4323_v60 = vld [vmem:[%s3451_s16 + $0x50] sm:$0x1]  ;;  %2591 = vst.msk [vmem:[#allocation2] sm:$0xff] %vm2590_vm14, %v2549_v14  ;;  %v3366_v16 = vld [vmem:[%s3451_s16 + $0x60] sm:$0xf] }
  0xb4   : > { %v3115_v34 = vcombine.low %v1669_v53, %v1672_v20  ;;  %v2056_v23 = vshrl.u32 %v4258_v56, 16  ;;  %v2059_v50 = vshll.u32 %v4258_v56, 16  ;;  %v2069_v41 = vshrl.u32 %v4261_v13, 16  ;;  %v3367_v1 = vld [vmem:[%s3451_s16 + $0x64] sm:$0xf] }
  0xb5   : > { %v1630_v10 = vsel %vm3490_vm4, %v1628_v49, %v1629_v43  ;;  %v2551_v63 = vpop.permute.xlu1 %2550  ;;  %v3171_v42 = vcombine.low %v4278_v51, %v4281_v44  ;;  %v2224_v30 = vshrl.u32 %v4278_v51, 16  ;;  %v2227_v35 = vshll.u32 %v4278_v51, 16  ;;  %v4341_v53 = vld [vmem:[%s3451_s16 + $0xa4] sm:$0x1] }
  0xb6   : > { %1737 = vrot.lane.b32.xlu0 %v3108_v12, %s3405_s18  ;;  %v3109_v29 = vcombine.low %v1627_v11, %v1630_v10  ;;  %v2237_v46 = vshrl.u32 %v4281_v44, 16  ;;  %v3165_v52 = vcombine.low %v4292_v24, %v4295_v55  ;;  %v2080_v8 = vshrl.u32 %v4292_v24, 16  ;;  %2592 = vst.msk [vmem:[#allocation2 + $0x8] sm:$0xff] %vm2590_vm14, %v2551_v63 }
  0xb7   : > { %1751 = vrot.lane.b32.xlu1 %v3115_v34, %s3405_s18  ;;  %v2083_v17 = vshll.u32 %v4292_v24, 16  ;;  %v2093_v19 = vshrl.u32 %v4295_v55, 16  ;;  %v2966_v22 = vcombine.low %v3364_v62, %v3365_v4  ;;  %v2202_v26 = vrot.slane %v2200_v9, 4 }
  0xb8   : > { %v2205_v5 = vrot.slane %v2203_v61, 5  ;;  %v2209_v0 = vshll.u32 %v4242_v15, 16  ;;  %v2215_v31 = vrot.slane %v2213_v45, 4  ;;  %v2219_v38 = vshll.u32 %v4316_v54, 16 }
  0xb9   : > { %v713_v48 = vpop.permute.xlu0 %712  ;;  %303 = vst.msk [vmem:[#allocation2 + $0x10] sm:$0xff] %vm300_vm6, %v2966_v22  ;;  %v2058_v59 = vrot.slane %v2056_v23, 4  ;;  %v2061_v6 = vrot.slane %v2059_v50, 5  ;;  %v2065_v36 = vshll.u32 %v4261_v13, 16  ;;  %v2071_v33 = vrot.slane %v2069_v41, 4 }
  0xba   : > { %1739 = vrot.lane.b32.xlu0 %v3109_v29, %s3405_s18  ;;  %741 = vst.msk [vmem:[#allocation2 + $0x10] sm:$0xff] %vm738_vm7, %v4252_v32  ;;  %v2206_v27 = vor.u32 %v2205_v5, %v2202_v26  ;;  %v2211_v40 = vrot.slane %v2209_v0, 5  ;;  %v2075_v18 = vshll.u32 %v4323_v60, 16  ;;  %v2221_v39 = vrot.slane %v2219_v38, 5 }
  0xbb   : > { %1922 = vrot.lane.b32.xlu1 %v3170_v37, %s3409_s22  ;;  %v2062_v58 = vor.u32 %v2061_v6, %v2058_v59  ;;  %v2067_v47 = vrot.slane %v2065_v36, 5  ;;  %v2972_v12 = vcombine.low %v3366_v16, %v3367_v1  ;;  %v2226_v37 = vrot.slane %v2224_v30, 4  ;;  %v3351_v26 = vld [vmem:[%s5011_s1 + $0x10] ss:$0 sps:$4 sm:$0x33]  }
  0xbc   : > { %v4336_v28 = vpop.permute.xlu1 %714  ;;  %v2207_v2 = vrot.slane %v2206_v27, 4  ;;  %v2216_v57 = vor.u32 %v2215_v31, %v2211_v40  ;;  %v2077_v43 = vrot.slane %v2075_v18, 5  ;;  %v2229_v11 = vrot.slane %v2227_v35, 5  ;;  %v3368_v6 = vld [vmem:[%s3451_s16 + $0x6c] sm:$0xf]  ;;  %3292 = vmatprep.subr.msk.bf16.mxu0 %vm2682_vm15, %v3351_v26  ;;  %3293 = vmatprep.subr.msk.bf16.mxu1 %vm2682_vm15, %v3351_v26 }
  0xbd   : > { %v2063_v32 = vrot.slane %v2062_v58, 4  ;;  %v2072_v20 = vor.u32 %v2071_v33, %v2067_v47  ;;  %309 = vst.msk [vmem:[#allocation2 + $0x40] sm:$0xff] %vm300_vm6, %v2972_v12  ;;  %v2233_v49 = vshll.u32 %v4281_v44, 16  ;;  %v2239_v34 = vrot.slane %v2237_v46, 4  ;;  %v3369_v36 = vld [vmem:[%s3451_s16 + $0x70] sm:$0xf] }
  0xbe   : > { %1910 = vrot.lane.b32.xlu0 %v3164_v25, %s3409_s22  ;;  %v2212_v9 = vsel %vm3526_vm5, %v2207_v2, %v2211_v40  ;;  %v2217_v14 = vrot.slane %v2216_v57, 4  ;;  %747 = vst.msk [vmem:[#allocation2 + $0x40] sm:$0xff] %vm738_vm7, %v713_v48  ;;  %v2243_v61 = vshll.u32 %v4341_v53, 16  ;;  %v2230_v50 = vor.u32 %v2229_v11, %v2226_v37  ;;  %v2605_v40 = vld [vmem:[#allocation2] sm:$0xff]  ;;  %v4387_v12 = vld [vmem:[%s3451_s16 + $0x90] sm:$0xf] }
  0xbf   : > { %1924 = vrot.lane.b32.xlu1 %v3171_v42, %s3409_s22  ;;  %v2068_v10 = vsel %vm3526_vm5, %v2063_v32, %v2067_v47  ;;  %v2073_v23 = vrot.slane %v2072_v20, 4  ;;  %v2235_v41 = vrot.slane %v2233_v49, 5  ;;  %v4357_v42 = vld [vmem:[%s3451_s16 + $0x5c] sm:$0x1]  ;;  %v2082_v30 = vrot.slane %v2080_v8, 4  ;;  %3258 = vmatprep.mubr.msk.bf16.mxu0 %vm2639_vm0, %v2605_v40  ;;  %v2606_v32 = vld [vmem:[#allocation2 + $0x8] sm:$0xff] }
  0xc0   : > { %v703_v45 = vpop.permute.xlu0 %702  ;;  %v927_v25 = vpop.permute.xlu1 %926  ;;  %v2222_v63 = vsel %vm3526_vm5, %v2217_v14, %v2221_v39  ;;  %v2245_v29 = vrot.slane %v2243_v61, 5  ;;  %v2085_v35 = vrot.slane %v2083_v17, 5  ;;  %v2231_v4 = vrot.slane %v2230_v50, 4  ;;  %v3371_v39 = vld [vmem:[%s3451_s16 + $0x28] sm:$0xf] }
  0xc1   : > { %961 = vst.msk [vmem:[#allocation2 + $0x40] sm:$0xff] %vm952_vm8, %v927_v25  ;;  %v3184_v46 = vcombine.low %v2212_v9, %v2222_v63  ;;  %v2078_v62 = vsel %vm3526_vm5, %v2073_v23, %v2077_v43  ;;  %v2240_v22 = vor.u32 %v2239_v34, %v2235_v41  ;;  %v2089_v17 = vshll.u32 %v4295_v55, 16  ;;  %v4402_v34 = vld [vmem:[%s3451_s16 + $0x94] sm:$0xf]  ;;  %v4424_v63 = vld [vmem:[%s3451_s16 + $0x48] sm:$0xf] }
  0xc2   : > { %1912 = vrot.lane.b32.xlu0 %v3165_v52, %s3409_s22  ;;  %v3178_v5 = vcombine.low %v2068_v10, %v2078_v62  ;;  %v2086_v8 = vor.u32 %v2085_v35, %v2082_v30  ;;  %v2095_v52 = vrot.slane %v2093_v19, 4  ;;  %v2236_v48 = vsel %vm3526_vm5, %v2231_v4, %v2235_v41  ;;  %v3370_v19 = vld [vmem:[%s3451_s16 + $0x24] sm:$0xf] }
  0xc3   : > { %2357 = vrot.lane.b32.xlu1 %v3184_v46, %s3410_s23  ;;  %v2241_v38 = vrot.slane %v2240_v22, 4  ;;  %v2099_v59 = vshll.u32 %v4357_v42, 16  ;;  %v2973_v27 = vcombine.low %v3368_v6, %v3369_v36  ;;  %v2091_v18 = vrot.slane %v2089_v17, 5  ;;  %v4432_v22 = vld [vmem:[%s3451_s16 + $0x4c] sm:$0xf] }
  0xc4   : > { %v915_v0 = vpop.permute.xlu0 %914  ;;  %v929_v31 = vpop.permute.xlu1 %928  ;;  %v2087_v33 = vrot.slane %v2086_v8, 4  ;;  %v2967_v58 = vcombine.low %v3370_v19, %v3371_v39  ;;  %v2684_v1 = vsel %vm2682_vm15, %v3351_v26, 0  ;;  %v3198_v37 = vrot.slane %v4239_v7, 9  ;;  %v4435_v26 = vld [vmem:[%s3451_s16 + $0x50] sm:$0x1] }
  0xc5   : > { %955 = vst.msk [vmem:[#allocation2 + $0x10] sm:$0xff] %vm952_vm8, %v915_v0  ;;  %v2246_v47 = vsel %vm3526_vm5, %v2241_v38, %v2245_v29  ;;  %v2101_v16 = vrot.slane %v2099_v59, 5  ;;  %v2096_v43 = vor.u32 %v2095_v52, %v2091_v18  ;;  %3257 = vmatpush3.bf16.msra.mxu0 %v2684_v1  ;;  %v2480_v49 = vrot.slane %v4242_v15, 5  ;;  %3291 = vmatpush3.bf16.msra.mxu1 %v2684_v1 }
  0xc6   : > { %2345 = vrot.lane.b32.xlu0 %v3178_v5, %s3410_s23  ;;  %310 = vst.msk [vmem:[#allocation2 + $0x48] sm:$0xff] %vm300_vm6, %v2973_v27  ;;  %v3185_v2 = vcombine.low %v2236_v48, %v2246_v47  ;;  %v2092_v57 = vsel %vm3526_vm5, %v2087_v33, %v2091_v18  ;;  %304 = vst.msk [vmem:[#allocation2 + $0x18] sm:$0xff] %vm300_vm6, %v2967_v58  ;;  %v2483_v9 = vrot.slane %v4316_v54, 5  ;;  %v3192_v14 = vrot.slane %v4258_v56, 9 }
  0xc7   : > { %748 = vst.msk [vmem:[#allocation2 + $0x48] sm:$0xff] %vm738_vm7, %v4336_v28  ;;  %742 = vst.msk [vmem:[#allocation2 + $0x18] sm:$0xff] %vm738_vm7, %v703_v45  ;;  %v2438_v28 = vrot.slane %v4261_v13, 5  ;;  %v2097_v7 = vrot.slane %v2096_v43, 4  ;;  %v2441_v15 = vrot.slane %v4323_v60, 5  ;;  %v607_v54 = vshrl.u32 %v4387_v12, 16 }
  0xc8   : > { %v917_v20 = vpop.permute.xlu0 %916  ;;  %v1100_v11 = vpop.permute.xlu1 %1099  ;;  %962 = vst.msk [vmem:[#allocation2 + $0x48] sm:$0xff] %vm952_vm8, %v929_v31  ;;  %2359 = vrot.lane.b32.xlu1 %v3185_v2, %s3410_s23  ;;  %v610_v56 = vshll.u32 %v4387_v12, 16  ;;  %v2481_v13 = vsel %vm3490_vm4, %v3198_v37, %v2480_v49  ;;  %v2482_v61 = vrot.slane %v2480_v49, 4  ;;  %3259 = vmatmul.mubr.msk.bf16.vlgmr.msra.gmra.mrb[0].mxu0 %vm2639_vm0, %v2606_v32  ;;  %v4418_v60 = vld [vmem:[%s3451_s16 + $0x98] sm:$0x1]  ;;  %v616_v41 = vshll.u32 %v4402_v34, 16 }
  0xc9   : > { %1134 = vst.msk [vmem:[#allocation2 + $0x40] sm:$0xff] %vm1125_vm9, %v1100_v11  ;;  %v2439_v45 = vsel %vm3490_vm4, %v3192_v14, %v2438_v28  ;;  %v2440_v25 = vrot.slane %v2438_v28, 4  ;;  %v2102_v10 = vsel %vm3526_vm5, %v2097_v7, %v2101_v16  ;;  %v609_v23 = vrot.slane %v607_v54, 4  ;;  %v4458_v14 = vld [vmem:[%s3451_s16 + $0x9c] sm:$0xf] }
  0xca   : > { %956 = vst.msk [vmem:[#allocation2 + $0x18] sm:$0xff] %vm952_vm8, %v917_v20  ;;  %v612_v50 = vrot.slane %v610_v56, 5  ;;  %v3179_v35 = vcombine.low %v2092_v57, %v2102_v10  ;;  %v2484_v46 = vsel %vm3490_vm4, %v2482_v61, %v2483_v9  ;;  %v620_v4 = vshrl.u32 %v4402_v34, 16  ;;  %v4476_v10 = vld [vmem:[%s3451_s16 + $0xa4] sm:$0x1] }
  0xcb   : > { %v2442_v62 = vsel %vm3490_vm4, %v2440_v25, %v2441_v15  ;;  %v3212_v5 = vcombine.low %v2481_v13, %v2484_v46  ;;  %v618_v52 = vrot.slane %v616_v41, 5  ;;  %v626_v31 = vshll.u32 %v4418_v60, 16  ;;  %v4489_v46 = vld [vmem:[%s3451_s16 + $0x58] sm:$0xf] }
  0xcc   : > { %v1088_v29 = vpop.permute.xlu0 %1087  ;;  %v1102_v30 = vpop.permute.xlu1 %1101  ;;  %v3206_v8 = vcombine.low %v2439_v45, %v2442_v62  ;;  %v613_v17 = vor.u32 %v612_v50, %v609_v23  ;;  %2347 = vrot.lane.b32.xlu0 %v3179_v35, %s3410_s23  ;;  %v622_v0 = vrot.slane %v620_v4, 4  ;;  %v463_v48 = vshrl.u32 %v4424_v63, 16  ;;  %v4486_v35 = vld [vmem:[%s3451_s16 + $0x54] sm:$0xf] }
  0xcd   : > { %1128 = vst.msk [vmem:[#allocation2 + $0x10] sm:$0xff] %vm1125_vm9, %v1088_v29  ;;  %1135 = vst.msk [vmem:[#allocation2 + $0x48] sm:$0xff] %vm1125_vm9, %v1102_v30  ;;  %v466_v38 = vshll.u32 %v4424_v63, 16  ;;  %2568 = vrot.lane.b32.xlu1 %v3212_v5, %s3411_s24  ;;  %v472_v6 = vshll.u32 %v4432_v22, 16  ;;  %v476_v36 = vshrl.u32 %v4432_v22, 16  ;;  %v482_v27 = vshll.u32 %v4435_v26, 16 }
  0xce   : > { %v614_v59 = vrot.slane %v613_v17, 4  ;;  %v623_v33 = vor.u32 %v622_v0, %v618_v52  ;;  %v628_v18 = vrot.slane %v626_v31, 5  ;;  %v465_v19 = vrot.slane %v463_v48, 4 }
  0xcf   : > { %v468_v39 = vrot.slane %v466_v38, 5  ;;  %v474_v16 = vrot.slane %v472_v6, 5  ;;  %v478_v1 = vrot.slane %v476_v36, 4  ;;  %v484_v2 = vrot.slane %v482_v27, 5 }
  0xd0   : > { %v1090_v40 = vpop.permute.xlu0 %1089  ;;  %v619_v47 = vsel %vm3526_vm5, %v614_v59, %v618_v52  ;;  %2556 = vrot.lane.b32.xlu0 %v3206_v8, %s3411_s24  ;;  %v624_v57 = vrot.slane %v623_v33, 4  ;;  %v3199_v37 = vrot.slane %v4278_v51, 9  ;;  %v2487_v32 = vrot.slane %v4281_v44, 5  ;;  %v4465_v44 = vld [vmem:[%s3451_s16 + $0xa0] sm:$0xf] }
  0xd1   : > { %1129 = vst.msk [vmem:[#allocation2 + $0x18] sm:$0xff] %vm1125_vm9, %v1090_v40  ;;  %v1535_v58 = vpop.permute.xlu1 %1534  ;;  %v469_v43 = vor.u32 %v468_v39, %v465_v19  ;;  %v479_v20 = vor.u32 %v478_v1, %v474_v16  ;;  %v2490_v11 = vrot.slane %v4341_v53, 5  ;;  %v3193_v49 = vrot.slane %v4292_v24, 9  ;;  %v4495_v8 = vld [vmem:[%s3451_s16 + $0x5c] sm:$0x1] }
  0xd2   : > { %1569 = vst.msk [vmem:[#allocation2 + $0x40] sm:$0xff] %vm1560_vm10, %v1535_v58  ;;  %v2445_v9 = vrot.slane %v4295_v55, 5  ;;  %v629_v7 = vsel %vm3526_vm5, %v624_v57, %v628_v18  ;;  %v2488_v51 = vsel %vm3490_vm4, %v3199_v37, %v2487_v32  ;;  %v2489_v54 = vrot.slane %v2487_v32, 4 }
  0xd3   : > { %v470_v15 = vrot.slane %v469_v43, 4  ;;  %v2990_v53 = vcombine.low %v619_v47, %v629_v7  ;;  %v480_v24 = vrot.slane %v479_v20, 4  ;;  %v2448_v25 = vrot.slane %v4357_v42, 5 }
  0xd4   : > { %v1523_v28 = vpop.permute.xlu0 %1522  ;;  %v2446_v55 = vsel %vm3490_vm4, %v3193_v49, %v2445_v9  ;;  %v2447_v56 = vrot.slane %v2445_v9, 4  ;;  %v2491_v45 = vsel %vm3490_vm4, %v2489_v54, %v2490_v11  ;;  %v631_v23 = vshrl.u32 %v4458_v14, 16 }
  0xd5   : > { %1563 = vst.msk [vmem:[#allocation2 + $0x10] sm:$0xff] %vm1560_vm10, %v1523_v28  ;;  %v475_v61 = vsel %vm3526_vm5, %v470_v15, %v474_v16  ;;  %720 = vrot.lane.b32.xlu1 %v2990_v53, %s3407_s20  ;;  %v485_v50 = vsel %vm3526_vm5, %v480_v24, %v484_v2  ;;  %v3213_v41 = vcombine.low %v2488_v51, %v2491_v45  ;;  %v634_v29 = vshll.u32 %v4458_v14, 16 }
  0xd6   : > { %v1537_v13 = vpop.permute.xlu1 %1536  ;;  %v640_v30 = vshll.u32 %v4465_v44, 16  ;;  %v2984_v42 = vcombine.low %v475_v61, %v485_v50  ;;  %v2449_v62 = vsel %vm3490_vm4, %v2447_v56, %v2448_v25  ;;  %v633_v4 = vrot.slane %v631_v23, 4 }
  0xd7   : > { %1570 = vst.msk [vmem:[#allocation2 + $0x48] sm:$0xff] %vm1560_vm10, %v1537_v13  ;;  %v644_v5 = vshrl.u32 %v4465_v44, 16  ;;  %v3207_v17 = vcombine.low %v2446_v55, %v2449_v62  ;;  %v636_v52 = vrot.slane %v634_v29, 5  ;;  %v650_v31 = vshll.u32 %v4476_v10, 16 }
  0xd8   : > { %v642_v0 = vrot.slane %v640_v30, 5  ;;  %708 = vrot.lane.b32.xlu0 %v2984_v42, %s3407_s20  ;;  %v487_v6 = vshrl.u32 %v4486_v35, 16  ;;  %v490_v36 = vshll.u32 %v4486_v35, 16  ;;  %v496_v27 = vshll.u32 %v4489_v46, 16 }
  0xd9   : > { %v646_v59 = vrot.slane %v644_v5, 4  ;;  %2570 = vrot.lane.b32.xlu1 %v3213_v41, %s3411_s24  ;;  %v637_v40 = vor.u32 %v636_v52, %v633_v4  ;;  %v652_v33 = vrot.slane %v650_v31, 5  ;;  %v500_v18 = vshrl.u32 %v4489_v46, 16  ;;  %v4537_v5 = vld [vmem:[%s3451_s16 + $0x9c] sm:$0xf] }
  0xda   : > { %v1525_v48 = vpop.permute.xlu0 %1524  ;;  %v1746_v38 = vpop.permute.xlu1 %1745  ;;  %v506_v19 = vshll.u32 %v4495_v8, 16  ;;  %v489_v58 = vrot.slane %v487_v6, 4  ;;  %v492_v47 = vrot.slane %v490_v36, 5  ;;  %v498_v16 = vrot.slane %v496_v27, 5 }
  0xdb   : > { %1564 = vst.msk [vmem:[#allocation2 + $0x18] sm:$0xff] %vm1560_vm10, %v1525_v48  ;;  %v647_v39 = vor.u32 %v646_v59, %v642_v0  ;;  %v638_v1 = vrot.slane %v637_v40, 4  ;;  %v502_v2 = vrot.slane %v500_v18, 4  ;;  %v3004_v43 = vrot.slane %v4387_v12, 9  ;;  %v4547_v48 = vld [vmem:[%s3451_s16 + $0x54] sm:$0xf] }
  0xdc   : > { %1780 = vst.msk [vmem:[#allocation2 + $0x40] sm:$0xff] %vm1771_vm11, %v1746_v38  ;;  %v508_v57 = vrot.slane %v506_v19, 5  ;;  %2558 = vrot.lane.b32.xlu0 %v3207_v17, %s3411_s24  ;;  %v493_v11 = vor.u32 %v492_v47, %v489_v58  ;;  %v856_v49 = vrot.slane %v4402_v34, 5  ;;  %v859_v9 = vrot.slane %v4418_v60, 5  ;;  %v4550_v38 = vld [vmem:[%s3451_s16 + $0x58] sm:$0xf] }
  0xdd   : > { %v648_v20 = vrot.slane %v647_v39, 4  ;;  %v643_v28 = vsel %vm3526_vm5, %v638_v1, %v642_v0  ;;  %v503_v7 = vor.u32 %v502_v2, %v498_v16  ;;  %v2998_v15 = vrot.slane %v4424_v63, 9  ;;  %v4562_v58 = vld [vmem:[%s3451_s16 + $0xa8] sm:$0xf]  ;;  %v4565_v47 = vld [vmem:[%s3451_s16 + $0xac] sm:$0xf] }
  0xde   : > { %v1734_v37 = vpop.permute.xlu0 %1733  ;;  %v1748_v32 = vpop.permute.xlu1 %1747  ;;  %v814_v51 = vrot.slane %v4432_v22, 5  ;;  %v494_v53 = vrot.slane %v493_v11, 4  ;;  %v857_v24 = vsel %vm3490_vm4, %v3004_v43, %v856_v49  ;;  %v858_v60 = vrot.slane %v856_v49, 4  ;;  %v4584_v11 = vld [vmem:[%s3451_s16 + $0x64] sm:$0xf] }
  0xdf   : > { %1774 = vst.msk [vmem:[#allocation2 + $0x10] sm:$0xff] %vm1771_vm11, %v1734_v37  ;;  %1781 = vst.msk [vmem:[#allocation2 + $0x48] sm:$0xff] %vm1771_vm11, %v1748_v32  ;;  %v653_v54 = vsel %vm3526_vm5, %v648_v20, %v652_v33  ;;  %v504_v56 = vrot.slane %v503_v7, 4  ;;  %v817_v41 = vrot.slane %v4435_v26, 5  ;;  %v3005_v29 = vrot.slane %v4458_v14, 9 }
  0xe0   : > { %v2991_v55 = vcombine.low %v643_v28, %v653_v54  ;;  %v815_v13 = vsel %vm3490_vm4, %v2998_v15, %v814_v51  ;;  %v816_v61 = vrot.slane %v814_v51, 4  ;;  %v499_v23 = vsel %vm3526_vm5, %v494_v53, %v498_v16  ;;  %v4540_v26 = vld [vmem:[%s3451_s16 + $0xa0] sm:$0xf] }
  0xe1   : > { %v860_v50 = vsel %vm3490_vm4, %v858_v60, %v859_v9  ;;  %v509_v30 = vsel %vm3526_vm5, %v504_v56, %v508_v57  ;;  %v863_v62 = vrot.slane %v4465_v44, 5  ;;  %v866_v4 = vrot.slane %v4476_v10, 5  ;;  %v4581_v20 = vld [vmem:[%s3451_s16 + $0x60] sm:$0xf] }
  0xe2   : > { %v1736_v45 = vpop.permute.xlu0 %1735  ;;  %v1919_v25 = vpop.permute.xlu1 %1918  ;;  %722 = vrot.lane.b32.xlu1 %v2991_v55, %s3407_s20  ;;  %v3018_v42 = vcombine.low %v857_v24, %v860_v50  ;;  %v2985_v17 = vcombine.low %v499_v23, %v509_v30  ;;  %v818_v52 = vsel %vm3490_vm4, %v816_v61, %v817_v41  ;;  %v2999_v0 = vrot.slane %v4486_v35, 9  ;;  %v4596_v55 = vld [vmem:[%s3451_s16 + $0xa4] sm:$0x1] }
  0xe3   : > { %1775 = vst.msk [vmem:[#allocation2 + $0x18] sm:$0xff] %vm1771_vm11, %v1736_v45  ;;  %v821_v31 = vrot.slane %v4489_v46, 5  ;;  %v3012_v59 = vcombine.low %v815_v13, %v818_v52  ;;  %v864_v10 = vsel %vm3490_vm4, %v3005_v29, %v863_v62  ;;  %v865_v6 = vrot.slane %v863_v62, 4  ;;  %v4609_v29 = vld [vmem:[%s3451_s16 + $0x5c] sm:$0x1] }
  0xe4   : > { %1953 = vst.msk [vmem:[#allocation2 + $0x40] sm:$0xff] %vm1944_vm12, %v1919_v25  ;;  %v824_v36 = vrot.slane %v4495_v8, 5  ;;  %710 = vrot.lane.b32.xlu0 %v2985_v17, %s3407_s20  ;;  %v3074_v19 = vcombine.low %v4537_v5, %v4540_v26  ;;  %v1429_v39 = vshrl.u32 %v4537_v5, 16  ;;  %v1432_v16 = vshll.u32 %v4537_v5, 16 }
  0xe5   : > { %v822_v33 = vsel %vm3490_vm4, %v2999_v0, %v821_v31  ;;  %v823_v18 = vrot.slane %v821_v31, 4  ;;  %v867_v8 = vsel %vm3490_vm4, %v865_v6, %v866_v4  ;;  %v1442_v1 = vshrl.u32 %v4540_v26, 16 }
  0xe6   : > { %v1907_v27 = vpop.permute.xlu0 %1906  ;;  %v1921_v40 = vpop.permute.xlu1 %1920  ;;  %934 = vrot.lane.b32.xlu1 %v3018_v42, %s3406_s19  ;;  %v3068_v2 = vcombine.low %v4547_v48, %v4550_v38  ;;  %v3019_v57 = vcombine.low %v864_v10, %v867_v8  ;;  %v1285_v37 = vshrl.u32 %v4547_v48, 16  ;;  %v1288_v32 = vshll.u32 %v4547_v48, 16  ;;  %v4620_v8 = vld [vmem:[%s3451_s16 + $0xb0] sm:$0x1] }
  0xe7   : > { %1947 = vst.msk [vmem:[#allocation2 + $0x10] sm:$0xff] %vm1944_vm12, %v1907_v27  ;;  %1954 = vst.msk [vmem:[#allocation2 + $0x48] sm:$0xff] %vm1944_vm12, %v1921_v40  ;;  %v825_v43 = vsel %vm3490_vm4, %v823_v18, %v824_v36  ;;  %v1298_v9 = vshrl.u32 %v4550_v38, 16  ;;  %v3075_v28 = vcombine.low %v4562_v58, %v4565_v47  ;;  %v1453_v7 = vshrl.u32 %v4562_v58, 16 }
  0xe8   : > { %v3013_v49 = vcombine.low %v822_v33, %v825_v43  ;;  %922 = vrot.lane.b32.xlu0 %v3012_v59, %s3406_s19  ;;  %v1456_v54 = vshll.u32 %v4562_v58, 16  ;;  %v1466_v53 = vshrl.u32 %v4565_v47, 16  ;;  %v3103_v24 = vrot.slane %v4562_v58, 9 }
  0xe9   : > { %v1682_v60 = vrot.slane %v4565_v47, 5  ;;  %v3069_v56 = vcombine.low %v4581_v20, %v4584_v11  ;;  %v1309_v13 = vshrl.u32 %v4581_v20, 16  ;;  %v1312_v61 = vshll.u32 %v4581_v20, 16 }
  0xea   : > { %v1909_v15 = vpop.permute.xlu0 %1908  ;;  %v2354_v51 = vpop.permute.xlu1 %2353  ;;  %936 = vrot.lane.b32.xlu1 %v3019_v57, %s3406_s19  ;;  %v1322_v45 = vshrl.u32 %v4584_v11, 16  ;;  %v3097_v25 = vrot.slane %v4581_v20, 9  ;;  %v1640_v23 = vrot.slane %v4584_v11, 5  ;;  %v1431_v50 = vrot.slane %v1429_v39, 4  ;;  %v4705_v20 = vld [vmem:[%s3451_s16 + $0x64] sm:$0xf] }
  0xeb   : > { %1948 = vst.msk [vmem:[#allocation2 + $0x18] sm:$0xff] %vm1944_vm12, %v1909_v15  ;;  %v1434_v41 = vrot.slane %v1432_v16, 5  ;;  %v1438_v30 = vshll.u32 %v4540_v26, 16  ;;  %v1444_v42 = vrot.slane %v1442_v1, 4  ;;  %v1448_v62 = vshll.u32 %v4596_v55, 16 }
  0xec   : > { %2388 = vst.msk [vmem:[#allocation2 + $0x40] sm:$0xff] %vm2379_vm13, %v2354_v51  ;;  %v1287_v4 = vrot.slane %v1285_v37, 4  ;;  %924 = vrot.lane.b32.xlu0 %v3013_v49, %s3406_s19  ;;  %v1290_v0 = vrot.slane %v1288_v32, 5  ;;  %v1294_v31 = vshll.u32 %v4550_v38, 16  ;;  %v1300_v59 = vrot.slane %v1298_v9, 4 }
  0xed   : > { %v1435_v52 = vor.u32 %v1434_v41, %v1431_v50  ;;  %v1440_v6 = vrot.slane %v1438_v30, 5  ;;  %v1450_v36 = vrot.slane %v1448_v62, 5  ;;  %v1304_v27 = vshll.u32 %v4609_v29, 16 }
  0xee   : > { %v2342_v17 = vpop.permute.xlu0 %2341  ;;  %1107 = vrot.lane.b32.xlu1 %v3074_v19, %s3404_s17  ;;  %v1455_v40 = vrot.slane %v1453_v7, 4  ;;  %v1291_v18 = vor.u32 %v1290_v0, %v1287_v4  ;;  %v1296_v39 = vrot.slane %v1294_v31, 5  ;;  %v1458_v16 = vrot.slane %v1456_v54, 5 }
  0xef   : > { %2382 = vst.msk [vmem:[#allocation2 + $0x10] sm:$0xff] %vm2379_vm13, %v2342_v17  ;;  %v2356_v10 = vpop.permute.xlu1 %2355  ;;  %v1436_v33 = vrot.slane %v1435_v52, 4  ;;  %v1445_v1 = vor.u32 %v1444_v42, %v1440_v6  ;;  %v1306_v57 = vrot.slane %v1304_v27, 5  ;;  %v1462_v43 = vshll.u32 %v4565_v47, 16  ;;  %v4636_v17 = vld [vmem:[%s3451_s16 + $0x68] sm:$0x1] }
  0xf0   : > { %2389 = vst.msk [vmem:[#allocation2 + $0x48] sm:$0xff] %vm2379_vm13, %v2356_v10  ;;  %v1468_v37 = vrot.slane %v1466_v53, 4  ;;  %1095 = vrot.lane.b32.xlu0 %v3068_v2, %s3404_s17  ;;  %v1292_v32 = vrot.slane %v1291_v18, 4  ;;  %v1301_v49 = vor.u32 %v1300_v59, %v1296_v39  ;;  %v1459_v9 = vor.u32 %v1458_v16, %v1455_v40 }
  0xf1   : > { %v1441_v19 = vsel %vm3526_vm5, %v1436_v33, %v1440_v6  ;;  %v1446_v51 = vrot.slane %v1445_v1, 4  ;;  %v1464_v54 = vrot.slane %v1462_v43, 5  ;;  %v1472_v50 = vshll.u32 %v4620_v8, 16 }
  0xf2   : > { %1109 = vrot.lane.b32.xlu1 %v3075_v28, %s3404_s17  ;;  %v1685_v41 = vrot.slane %v4620_v8, 5  ;;  %v1297_v2 = vsel %vm3526_vm5, %v1292_v32, %v1296_v39  ;;  %v1302_v53 = vrot.slane %v1301_v49, 4  ;;  %v1460_v30 = vrot.slane %v1459_v9, 4  ;;  %v4665_v9 = vld [vmem:[%s3451_s16 + $0xa8] sm:$0xf] }
  0xf3   : > { %v2344_v7 = vpop.permute.xlu0 %2343  ;;  %v2565_v15 = vpop.permute.xlu1 %2564  ;;  %v1311_v42 = vrot.slane %v1309_v13, 4  ;;  %v1451_v62 = vsel %vm3526_vm5, %v1446_v51, %v1450_v36  ;;  %v1469_v28 = vor.u32 %v1468_v37, %v1464_v54  ;;  %v1474_v4 = vrot.slane %v1472_v50, 5  ;;  %v4679_v51 = vld [vmem:[%s3451_s16 + $0xac] sm:$0xf] }
  0xf4   : > { %2383 = vst.msk [vmem:[#allocation2 + $0x18] sm:$0xff] %vm2379_vm13, %v2344_v7  ;;  %v1314_v52 = vrot.slane %v1312_v61, 5  ;;  %1097 = vrot.lane.b32.xlu0 %v3069_v56, %s3404_s17  ;;  %v3088_v0 = vcombine.low %v1441_v19, %v1451_v62  ;;  %v1307_v31 = vsel %vm3526_vm5, %v1302_v53, %v1306_v57  ;;  %v1465_v59 = vsel %vm3526_vm5, %v1460_v30, %v1464_v54  ;;  %v4702_v30 = vld [vmem:[%s3451_s16 + $0x60] sm:$0xf] }
  0xf5   : > { %2599 = vst.msk [vmem:[#allocation2 + $0x40] sm:$0xff] %vm2590_vm14, %v2565_v15  ;;  %v1318_v10 = vshll.u32 %v4584_v11, 16  ;;  %v3082_v6 = vcombine.low %v1297_v2, %v1307_v31  ;;  %v1470_v27 = vrot.slane %v1469_v28, 4  ;;  %v1324_v40 = vrot.slane %v1322_v45, 4  ;;  %v4715_v11 = vld [vmem:[%s3451_s16 + $0xb8] sm:$0xf] }
  0xf6   : > { %v1315_v36 = vor.u32 %v1314_v52, %v1311_v42  ;;  %1542 = vrot.lane.b32.xlu1 %v3088_v0, %s3408_s21  ;;  %v1328_v61 = vshll.u32 %v4636_v17, 16  ;;  %v1643_v33 = vrot.slane %v4636_v17, 5  ;;  %v3102_v18 = vrot.slane %v4537_v5, 9 }
  0xf7   : > { %v2553_v13 = vpop.permute.xlu0 %2552  ;;  %v1320_v56 = vrot.slane %v1318_v10, 5  ;;  %v1475_v39 = vsel %vm3526_vm5, %v1470_v27, %v1474_v4  ;;  %v1675_v16 = vrot.slane %v4540_v26, 5  ;;  %v1678_v45 = vrot.slane %v4596_v55, 5  ;;  %v4728_v10 = vld [vmem:[%s3451_s16 + $0x70] sm:$0xf] }
  0xf8   : > { %2593 = vst.msk [vmem:[#allocation2 + $0x10] sm:$0xff] %vm2590_vm14, %v2553_v13  ;;  %v1316_v8 = vrot.slane %v1315_v36, 4  ;;  %1530 = vrot.lane.b32.xlu0 %v3082_v6, %s3408_s21  ;;  %v3089_v1 = vcombine.low %v1465_v59, %v1475_v39  ;;  %v1330_v43 = vrot.slane %v1328_v61, 5  ;;  %v3096_v37 = vrot.slane %v4547_v48, 9  ;;  %v4725_v59 = vld [vmem:[%s3451_s16 + $0x6c] sm:$0xf] }
  0xf9   : > { %v1325_v57 = vor.u32 %v1324_v40, %v1320_v56  ;;  %v1676_v49 = vsel %vm3490_vm4, %v3102_v18, %v1675_v16  ;;  %v1677_v26 = vrot.slane %v1675_v16, 4  ;;  %v1633_v55 = vrot.slane %v4550_v38, 5 }
  0xfa   : > { %v1321_v32 = vsel %vm3526_vm5, %v1316_v8, %v1320_v56  ;;  %1544 = vrot.lane.b32.xlu1 %v3089_v1, %s3408_s21  ;;  %v1636_v7 = vrot.slane %v4609_v29, 5  ;;  %v1683_v15 = vsel %vm3490_vm4, %v3103_v24, %v1682_v60  ;;  %v1684_v38 = vrot.slane %v1682_v60, 4  ;;  %v4748_v1 = vld [vmem:[%s3451_s16 + $0xb0] sm:$0x1] }
  0xfb   : > { %v4657_v19 = vpop.permute.xlu1 %716  ;;  %v1326_v48 = vrot.slane %v1325_v57, 4  ;;  %v1679_v54 = vsel %vm3490_vm4, %v1677_v26, %v1678_v45  ;;  %v1634_v50 = vsel %vm3490_vm4, %v3096_v37, %v1633_v55  ;;  %v1635_v29 = vrot.slane %v1633_v55, 4  ;;  %v3372_v37 = vld [vmem:[%s3451_s16 + $0x78] sm:$0xf]  ;;  %v3375_v26 = vld [vmem:[%s3451_s16 + $0x34] sm:$0xf] }
  0xfc   : > { %v2613_v5 = vld [vmem:[#allocation2 + $0x40] sm:$0xff]  ;;  %v4691_v58 = vsel %vm3490_vm4, %v3097_v25, %v1640_v23  ;;  %v3116_v60 = vcombine.low %v1676_v49, %v1679_v54  ;;  %v1686_v2 = vsel %vm3490_vm4, %v1684_v38, %v1685_v41  ;;  %v1642_v53 = vrot.slane %v1640_v23, 4  ;;  %v4712_v41 = vld [vmem:[%s3451_s16 + $0xb4] sm:$0xf]  ;;  %v3374_v49 = vld [vmem:[%s3451_s16 + $0x30] sm:$0xf] }
  0xfd   : > { %3274 = vmatprep.mubr.msk.bf16.mxu1 %vm2639_vm0, %v2613_v5  ;;  %v1331_v24 = vsel %vm3526_vm5, %v1326_v48, %v1330_v43  ;;  %v1637_v28 = vsel %vm3490_vm4, %v1635_v29, %v1636_v7  ;;  %v3117_v4 = vcombine.low %v1683_v15, %v1686_v2  ;;  %v3172_v17 = vcombine.low %v4665_v9, %v4679_v51  ;;  %v3373_v5 = vld [vmem:[%s3451_s16 + $0x7c] sm:$0xf]  ;;  %v4758_v48 = vld [vmem:[%s3451_s16 + $0x68] sm:$0x1] }
  0xfe   : > { %v4693_v47 = vpop.permute.xlu0 %704  ;;  %v3083_v62 = vcombine.low %v1321_v32, %v1331_v24  ;;  %1753 = vrot.lane.b32.xlu1 %v3116_v60, %s3405_s18  ;;  %v3110_v23 = vcombine.low %v1634_v50, %v1637_v28  ;;  %v1644_v52 = vsel %vm3490_vm4, %v1642_v53, %v1643_v33  ;;  %v2248_v0 = vshrl.u32 %v4665_v9, 16 }
  0xff   : > { %v2567_v42 = vpop.permute.xlu1 %2566  ;;  %v2607_v25 = vld [vmem:[#allocation2 + $0x10] sm:$0xff]  ;;  %v2251_v31 = vshll.u32 %v4665_v9, 16  ;;  %v3111_v13 = vcombine.low %v4691_v58, %v1644_v52  ;;  %v2261_v6 = vshrl.u32 %v4679_v51, 16  ;;  %v3166_v27 = vcombine.low %v4702_v30, %v4705_v20  ;;  %v4776_v52 = vld [vmem:[%s3451_s16 + $0xbc] sm:$0x1] }
 0x100   : > { %2600 = vst.msk [vmem:[#allocation2 + $0x48] sm:$0xff] %vm2590_vm14, %v2567_v42  ;;  %3262 = vmatprep.mubr.msk.bf16.mxu0 %vm2639_vm0, %v2607_v25  ;;  %1532 = vrot.lane.b32.xlu0 %v3083_v62, %s3408_s21  ;;  %v2104_v36 = vshrl.u32 %v4702_v30, 16  ;;  %v2107_v56 = vshll.u32 %v4702_v30, 16  ;;  %v2117_v61 = vshrl.u32 %v4705_v20, 16  ;;  %v3173_v33 = vcombine.low %v4712_v41, %v4715_v11 }
 0x101   : > { %v2272_v18 = vshrl.u32 %v4712_v41, 16  ;;  %v2275_v39 = vshll.u32 %v4712_v41, 16  ;;  %v2285_v8 = vshrl.u32 %v4715_v11, 16  ;;  %v3167_v16 = vcombine.low %v4725_v59, %v4728_v10 }
 0x102   : > { %v2555_v40 = vpop.permute.xlu0 %2554  ;;  %v2128_v45 = vshrl.u32 %v4725_v59, 16  ;;  %1755 = vrot.lane.b32.xlu1 %v3117_v4, %s3405_s18  ;;  %v2131_v57 = vshll.u32 %v4725_v59, 16  ;;  %v2141_v43 = vshrl.u32 %v4728_v10, 16  ;;  %v2974_v32 = vcombine.low %v3372_v37, %v3373_v5 }
 0x103   : > { %2594 = vst.msk [vmem:[#allocation2 + $0x18] sm:$0xff] %vm2590_vm14, %v2555_v40  ;;  %v2968_v55 = vcombine.low %v3374_v49, %v3375_v26  ;;  %v2250_v7 = vrot.slane %v2248_v0, 4  ;;  %v2253_v15 = vrot.slane %v2251_v31, 5  ;;  %v2257_v38 = vshll.u32 %v4679_v51, 16 }
 0x104   : > { %1741 = vrot.lane.b32.xlu0 %v3110_v23, %s3405_s18  ;;  %v2263_v54 = vrot.slane %v2261_v6, 4  ;;  %311 = vst.msk [vmem:[#allocation2 + $0x50] sm:$0xff] %vm300_vm6, %v2974_v32  ;;  %v2267_v50 = vshll.u32 %v4748_v1, 16  ;;  %v2106_v29 = vrot.slane %v2104_v36, 4  ;;  %v2109_v58 = vrot.slane %v2107_v56, 5 }
 0x105   : > { %305 = vst.msk [vmem:[#allocation2 + $0x20] sm:$0xff] %vm300_vm6, %v2968_v55  ;;  %v2113_v24 = vshll.u32 %v4705_v20, 16  ;;  %v2254_v2 = vor.u32 %v2253_v15, %v2250_v7  ;;  %v2259_v53 = vrot.slane %v2257_v38, 5  ;;  %v2119_v42 = vrot.slane %v2117_v61, 4 }
 0x106   : > { %749 = vst.msk [vmem:[#allocation2 + $0x50] sm:$0xff] %vm738_vm7, %v4657_v19  ;;  %743 = vst.msk [vmem:[#allocation2 + $0x20] sm:$0xff] %vm738_vm7, %v4693_v47  ;;  %v2123_v25 = vshll.u32 %v4758_v48, 16  ;;  %1926 = vrot.lane.b32.xlu1 %v3172_v17, %s3409_s22  ;;  %v2269_v28 = vrot.slane %v2267_v50, 5  ;;  %v2110_v4 = vor.u32 %v2109_v58, %v2106_v29  ;;  %v2274_v19 = vrot.slane %v2272_v18, 4 }
 0x107   : > { %v2614_v60 = vld [vmem:[#allocation2 + $0x48] sm:$0xff]  ;;  %v2115_v23 = vrot.slane %v2113_v24, 5  ;;  %v2255_v47 = vrot.slane %v2254_v2, 4  ;;  %v2264_v0 = vor.u32 %v2263_v54, %v2259_v53  ;;  %v2277_v6 = vrot.slane %v2275_v39, 5  ;;  %v4795_v54 = vld [vmem:[%s3451_s16 + $0x74] sm:$0x1] }
 0x108   : > { %v4771_v62 = vpop.permute.xlu1 %718  ;;  %3275 = vmatmul.mubr.msk.bf16.vlgmr.msra.gmra.mrb[0].mxu1 %vm2639_vm0, %v2614_v60  ;;  %1743 = vrot.lane.b32.xlu0 %v3111_v13, %s3405_s18  ;;  %v2125_v31 = vrot.slane %v2123_v25, 5  ;;  %v2111_v40 = vrot.slane %v2110_v4, 4  ;;  %v2281_v61 = vshll.u32 %v4715_v11, 16  ;;  %v2287_v37 = vrot.slane %v2285_v8, 4  ;;  %v3376_v4 = vld [vmem:[%s3451_s16 + $0x84] sm:$0xf] }
 0x109   : > { %v2120_v56 = vor.u32 %v2119_v42, %v2115_v23  ;;  %v2260_v17 = vsel %vm3526_vm5, %v2255_v47, %v2259_v53  ;;  %v2265_v5 = vrot.slane %v2264_v0, 4  ;;  %v2278_v18 = vor.u32 %v2277_v6, %v2274_v19  ;;  %v3379_v0 = vld [vmem:[%s3451_s16 + $0x40] sm:$0xf] }
 0x10a   : > { %v2608_v36 = vld [vmem:[#allocation2 + $0x18] sm:$0xff]  ;;  %v2291_v13 = vshll.u32 %v4776_v52, 16  ;;  %1928 = vrot.lane.b32.xlu1 %v3173_v33, %s3409_s22  ;;  %v2116_v39 = vsel %vm3526_vm5, %v2111_v40, %v2115_v23  ;;  %v2283_v55 = vrot.slane %v2281_v61, 5  ;;  %v2130_v8 = vrot.slane %v2128_v45, 4  ;;  %v3377_v23 = vld [vmem:[%s3451_s16 + $0x88] sm:$0xf] }
 0x10b   : > { %3263 = vmatmul.mubr.msk.bf16.gmra.mrb[4].mxu0 %vm2639_vm0, %v2608_v36  ;;  %v2121_v26 = vrot.slane %v2120_v56, 4  ;;  %v2270_v7 = vsel %vm3526_vm5, %v2265_v5, %v2269_v28  ;;  %v2279_v15 = vrot.slane %v2278_v18, 4  ;;  %v2133_v33 = vrot.slane %v2131_v57, 5 }
 0x10c   : > { %v707_v32 = vpop.permute.xlu0 %706  ;;  %v931_v49 = vpop.permute.xlu1 %930  ;;  %1914 = vrot.lane.b32.xlu0 %v3166_v27, %s3409_s22  ;;  %v2293_v38 = vrot.slane %v2291_v13, 5  ;;  %v3186_v50 = vcombine.low %v2260_v17, %v2270_v7  ;;  %v2288_v29 = vor.u32 %v2287_v37, %v2283_v55  ;;  %v2137_v58 = vshll.u32 %v4728_v10, 16 }
 0x10d   : > { %963 = vst.msk [vmem:[#allocation2 + $0x50] sm:$0xff] %vm952_vm8, %v931_v49  ;;  %v2126_v45 = vsel %vm3526_vm5, %v2121_v26, %v2125_v31  ;;  %v2284_v27 = vsel %vm3526_vm5, %v2279_v15, %v2283_v55  ;;  %v2134_v60 = vor.u32 %v2133_v33, %v2130_v8  ;;  %v2143_v2 = vrot.slane %v2141_v43, 4  ;;  %v3378_v43 = vld [vmem:[%s3451_s16 + $0x3c] sm:$0xf] }
 0x10e   : > { %v3180_v24 = vcombine.low %v2116_v39, %v2126_v45  ;;  %2361 = vrot.lane.b32.xlu1 %v3186_v50, %s3410_s23  ;;  %v2289_v42 = vrot.slane %v2288_v29, 4  ;;  %v2139_v25 = vrot.slane %v2137_v58, 5  ;;  %v2147_v28 = vshll.u32 %v4795_v54, 16 }
 0x10f   : > { %v2975_v19 = vcombine.low %v3376_v4, %v3377_v23  ;;  %v2135_v47 = vrot.slane %v2134_v60, 4  ;;  %v2969_v31 = vcombine.low %v3378_v43, %v3379_v0  ;;  %v3200_v6 = vrot.slane %v4665_v9, 9 }
 0x110   : > { %v919_v53 = vpop.permute.xlu0 %918  ;;  %v933_v57 = vpop.permute.xlu1 %932  ;;  %1916 = vrot.lane.b32.xlu0 %v3167_v16, %s3409_s22  ;;  %v2494_v36 = vrot.slane %v4679_v51, 5  ;;  %v2294_v40 = vsel %vm3526_vm5, %v2289_v42, %v2293_v38  ;;  %v2144_v56 = vor.u32 %v2143_v2, %v2139_v25  ;;  %v2149_v61 = vrot.slane %v2147_v28, 5 }
 0x111   : > { %957 = vst.msk [vmem:[#allocation2 + $0x20] sm:$0xff] %vm952_vm8, %v919_v53  ;;  %v2497_v37 = vrot.slane %v4748_v1, 5  ;;  %v3187_v17 = vcombine.low %v2284_v27, %v2294_v40  ;;  %v2140_v16 = vsel %vm3526_vm5, %v2135_v47, %v2139_v25  ;;  %v3194_v1 = vrot.slane %v4702_v30, 9 }
 0x112   : > { %312 = vst.msk [vmem:[#allocation2 + $0x58] sm:$0xff] %vm300_vm6, %v2975_v19  ;;  %306 = vst.msk [vmem:[#allocation2 + $0x28] sm:$0xff] %vm300_vm6, %v2969_v31  ;;  %v2495_v9 = vsel %vm3490_vm4, %v3200_v6, %v2494_v36  ;;  %v2496_v51 = vrot.slane %v2494_v36, 4  ;;  %v2145_v13 = vrot.slane %v2144_v56, 4  ;;  %v2452_v49 = vrot.slane %v4705_v20, 5 }
 0x113   : > { %750 = vst.msk [vmem:[#allocation2 + $0x58] sm:$0xff] %vm738_vm7, %v4771_v62  ;;  %744 = vst.msk [vmem:[#allocation2 + $0x28] sm:$0xff] %vm738_vm7, %v707_v32  ;;  %v2455_v39 = vrot.slane %v4758_v48, 5  ;;  %2363 = vrot.lane.b32.xlu1 %v3187_v17, %s3410_s23  ;;  %v3201_v26 = vrot.slane %v4712_v41, 9  ;;  %v2501_v32 = vrot.slane %v4715_v11, 5  ;;  %v2504_v30 = vrot.slane %v4776_v52, 5 }
 0x114   : > { %v921_v5 = vpop.permute.xlu0 %920  ;;  %v1104_v18 = vpop.permute.xlu1 %1103  ;;  %964 = vst.msk [vmem:[#allocation2 + $0x58] sm:$0xff] %vm952_vm8, %v933_v57  ;;  %2349 = vrot.lane.b32.xlu0 %v3180_v24, %s3410_s23  ;;  %v2498_v62 = vsel %vm3490_vm4, %v2496_v51, %v2497_v37  ;;  %v2150_v20 = vsel %vm3526_vm5, %v2145_v13, %v2149_v61  ;;  %v2453_v55 = vsel %vm3490_vm4, %v3194_v1, %v2452_v49  ;;  %v2454_v8 = vrot.slane %v2452_v49, 4 }
 0x115   : > { %1136 = vst.msk [vmem:[#allocation2 + $0x50] sm:$0xff] %vm1125_vm9, %v1104_v18  ;;  %v3214_v48 = vcombine.low %v2495_v9, %v2498_v62  ;;  %v3181_v7 = vcombine.low %v2140_v16, %v2150_v20  ;;  %v2502_v15 = vsel %vm3490_vm4, %v3201_v26, %v2501_v32  ;;  %v2503_v38 = vrot.slane %v2501_v32, 4 }
 0x116   : > { %958 = vst.msk [vmem:[#allocation2 + $0x28] sm:$0xff] %vm952_vm8, %v921_v5  ;;  %v3195_v41 = vrot.slane %v4725_v59, 9  ;;  %v2456_v52 = vsel %vm3490_vm4, %v2454_v8, %v2455_v39  ;;  %v2459_v3 = vrot.slane %v4728_v10, 5  ;;  %v2462_v50 = vrot.slane %v4795_v54, 5 }
 0x117   : > { %v2976_v45 = vcombine.low %v4387_v12, %v4402_v34  ;;  %2572 = vrot.lane.b32.xlu1 %v3214_v48, %s3411_s24  ;;  %v3208_v59 = vcombine.low %v2453_v55, %v2456_v52  ;;  %v2505_v29 = vsel %vm3490_vm4, %v2503_v38, %v2504_v30  ;;  %v2970_v10 = vcombine.low %v4424_v63, %v4432_v22 }
 0x118   : > { %v1092_v11 = vpop.permute.xlu0 %1091  ;;  %v1106_v33 = vpop.permute.xlu1 %1105  ;;  %2351 = vrot.lane.b32.xlu0 %v3181_v7, %s3410_s23  ;;  %v3215_v58 = vcombine.low %v2502_v15, %v2505_v29  ;;  %v2460_v54 = vsel %vm3490_vm4, %v3195_v41, %v2459_v3  ;;  %v2461_v24 = vrot.slane %v2459_v3, 4  ;;  %v2977_v12 = vcombine.low %v4458_v14, %v4465_v44 }
 0x119   : > { %1130 = vst.msk [vmem:[#allocation2 + $0x20] sm:$0xff] %vm1125_vm9, %v1092_v11  ;;  %1137 = vst.msk [vmem:[#allocation2 + $0x58] sm:$0xff] %vm1125_vm9, %v1106_v33  ;;  %v2971_v60 = vcombine.low %v4486_v35, %v4489_v46 }
 0x11a   : > { %313 = vst.msk [vmem:[#allocation2 + $0x60] sm:$0xff] %vm300_vm6, %v2976_v45  ;;  %307 = vst.msk [vmem:[#allocation2 + $0x30] sm:$0xff] %vm300_vm6, %v2970_v10  ;;  %v2463_v63 = vsel %vm3490_vm4, %v2461_v24, %v2462_v50 }
 0x11b   : > { %314 = vst.msk [vmem:[#allocation2 + $0x68] sm:$0xff] %vm300_vm6, %v2977_v12  ;;  %2574 = vrot.lane.b32.xlu1 %v3215_v58, %s3411_s24  ;;  %v3209_v22 = vcombine.low %v2460_v54, %v2463_v63  ;;  %308 = vst.msk [vmem:[#allocation2 + $0x38] sm:$0xff] %vm300_vm6, %v2971_v60 }
 0x11c   : > { %v1094_v34 = vpop.permute.xlu0 %1093  ;;  %v1539_v27 = vpop.permute.xlu1 %1538  ;;  %2560 = vrot.lane.b32.xlu0 %v3208_v59, %s3411_s24 }
 0x11d   : > { %1131 = vst.msk [vmem:[#allocation2 + $0x28] sm:$0xff] %vm1125_vm9, %v1094_v34 }
 0x11e   : > { %1571 = vst.msk [vmem:[#allocation2 + $0x50] sm:$0xff] %vm1560_vm10, %v1539_v27 }
 0x120   : > { %v1527_v14 = vpop.permute.xlu0 %1526  ;;  %2562 = vrot.lane.b32.xlu0 %v3209_v22, %s3411_s24 }
 0x121   : > { %1565 = vst.msk [vmem:[#allocation2 + $0x20] sm:$0xff] %vm1560_vm10, %v1527_v14  ;;  %v1541_v21 = vpop.permute.xlu1 %1540 }
 0x122   : > { %1572 = vst.msk [vmem:[#allocation2 + $0x58] sm:$0xff] %vm1560_vm10, %v1541_v21 }
 0x124   : > { %v1529_v44 = vpop.permute.xlu0 %1528 }
 0x125   : > { %1566 = vst.msk [vmem:[#allocation2 + $0x28] sm:$0xff] %vm1560_vm10, %v1529_v44  ;;  %v1750_v35 = vpop.permute.xlu1 %1749 }
 0x126   : > { %1782 = vst.msk [vmem:[#allocation2 + $0x50] sm:$0xff] %vm1771_vm11, %v1750_v35 }
 0x128   : > { %v1738_v46 = vpop.permute.xlu0 %1737 }
 0x129   : > { %1776 = vst.msk [vmem:[#allocation2 + $0x20] sm:$0xff] %vm1771_vm11, %v1738_v46  ;;  %v1752_v2 = vpop.permute.xlu1 %1751 }
 0x12a   : > { %1783 = vst.msk [vmem:[#allocation2 + $0x58] sm:$0xff] %vm1771_vm11, %v1752_v2 }
 0x12c   : > { %v1740_v53 = vpop.permute.xlu0 %1739 }
 0x12d   : > { %1777 = vst.msk [vmem:[#allocation2 + $0x28] sm:$0xff] %vm1771_vm11, %v1740_v53  ;;  %v1923_v57 = vpop.permute.xlu1 %1922 }
 0x12e   : > { %1955 = vst.msk [vmem:[#allocation2 + $0x50] sm:$0xff] %vm1944_vm12, %v1923_v57 }
 0x130   : > { %v1911_v42 = vpop.permute.xlu0 %1910 }
 0x131   : > { %1949 = vst.msk [vmem:[#allocation2 + $0x20] sm:$0xff] %vm1944_vm12, %v1911_v42  ;;  %v1925_v25 = vpop.permute.xlu1 %1924 }
 0x132   : > { %1956 = vst.msk [vmem:[#allocation2 + $0x58] sm:$0xff] %vm1944_vm12, %v1925_v25 }
 0x134   : > { %v1913_v28 = vpop.permute.xlu0 %1912 }
 0x135   : > { %1950 = vst.msk [vmem:[#allocation2 + $0x28] sm:$0xff] %vm1944_vm12, %v1913_v28  ;;  %v2358_v4 = vpop.permute.xlu1 %2357 }
 0x136   : > { %2390 = vst.msk [vmem:[#allocation2 + $0x50] sm:$0xff] %vm2379_vm13, %v2358_v4 }
 0x138   : > { %v2346_v23 = vpop.permute.xlu0 %2345 }
 0x139   : > { %2384 = vst.msk [vmem:[#allocation2 + $0x20] sm:$0xff] %vm2379_vm13, %v2346_v23 }
 0x13a   : > { %v2360_v19 = vpop.permute.xlu1 %2359 }
 0x13b   : > { %2391 = vst.msk [vmem:[#allocation2 + $0x58] sm:$0xff] %vm2379_vm13, %v2360_v19 }
 0x13e   : > { %v2348_v47 = vpop.permute.xlu0 %2347 }
 0x13f   : > { %2385 = vst.msk [vmem:[#allocation2 + $0x28] sm:$0xff] %vm2379_vm13, %v2348_v47  ;;  %v2569_v43 = vpop.permute.xlu1 %2568 }
 0x140   : > { %2601 = vst.msk [vmem:[#allocation2 + $0x50] sm:$0xff] %vm2590_vm14, %v2569_v43 }
 0x142   : > { %v2557_v0 = vpop.permute.xlu0 %2556 }
 0x143   : > { %2595 = vst.msk [vmem:[#allocation2 + $0x20] sm:$0xff] %vm2590_vm14, %v2557_v0 }
 0x147   : > { %v721_v31 = vpop.permute.xlu1 %720  ;;  %v2615_v6 = vld [vmem:[#allocation2 + $0x50] sm:$0xff] }
 0x148   : > { %751 = vst.msk [vmem:[#allocation2 + $0x60] sm:$0xff] %vm738_vm7, %v721_v31  ;;  %3278 = vmatprep.mubr.msk.bf16.mxu1 %vm2639_vm0, %v2615_v6 }
 0x14a   : > { %v709_v36 = vpop.permute.xlu0 %708  ;;  %v2609_v40 = vld [vmem:[#allocation2 + $0x20] sm:$0xff] }
 0x14b   : > { %745 = vst.msk [vmem:[#allocation2 + $0x30] sm:$0xff] %vm738_vm7, %v709_v36  ;;  %v2571_v56 = vpop.permute.xlu1 %2570  ;;  %3266 = vmatprep.mubr.msk.bf16.mxu0 %vm2639_vm0, %v2609_v40 }
 0x14c   : > { %2602 = vst.msk [vmem:[#allocation2 + $0x58] sm:$0xff] %vm2590_vm14, %v2571_v56 }
 0x14e   : > { %v2559_v61 = vpop.permute.xlu0 %2558 }
 0x14f   : > { %2596 = vst.msk [vmem:[#allocation2 + $0x28] sm:$0xff] %vm2590_vm14, %v2559_v61 }
 0x153   : > { %v2616_v17 = vld [vmem:[#allocation2 + $0x58] sm:$0xff] }
 0x154   : > { %v723_v37 = vpop.permute.xlu1 %722  ;;  %3279 = vmatmul.mubr.msk.bf16.gmra.mrb[4].mxu1 %vm2639_vm0, %v2616_v17 }
 0x155   : > { %752 = vst.msk [vmem:[#allocation2 + $0x68] sm:$0xff] %vm738_vm7, %v723_v37 }
 0x156   : > { %v711_v16 = vpop.permute.xlu0 %710  ;;  %v2610_v9 = vld [vmem:[#allocation2 + $0x28] sm:$0xff] }
 0x157   : > { %746 = vst.msk [vmem:[#allocation2 + $0x38] sm:$0xff] %vm738_vm7, %v711_v16  ;;  %3267 = vmatmul.mubr.msk.bf16.gmra.mrb[8].mxu0 %vm2639_vm0, %v2610_v9 }
 0x158   : > { %v935_v51 = vpop.permute.xlu1 %934 }
 0x159   : > { %965 = vst.msk [vmem:[#allocation2 + $0x60] sm:$0xff] %vm952_vm8, %v935_v51 }
 0x15a   : > { %v923_v5 = vpop.permute.xlu0 %922 }
 0x15b   : > { %959 = vst.msk [vmem:[#allocation2 + $0x30] sm:$0xff] %vm952_vm8, %v923_v5 }
 0x15c   : > { %v937_v18 = vpop.permute.xlu1 %936 }
 0x15d   : > { %966 = vst.msk [vmem:[#allocation2 + $0x68] sm:$0xff] %vm952_vm8, %v937_v18 }
 0x15e   : > { %v925_v13 = vpop.permute.xlu0 %924 }
 0x15f   : > { %960 = vst.msk [vmem:[#allocation2 + $0x38] sm:$0xff] %vm952_vm8, %v925_v13 }
 0x160   : > { %v1108_v1 = vpop.permute.xlu1 %1107 }
 0x161   : > { %1138 = vst.msk [vmem:[#allocation2 + $0x60] sm:$0xff] %vm1125_vm9, %v1108_v1 }
 0x162   : > { %v1096_v49 = vpop.permute.xlu0 %1095 }
 0x163   : > { %1132 = vst.msk [vmem:[#allocation2 + $0x30] sm:$0xff] %vm1125_vm9, %v1096_v49 }
 0x164   : > { %v1110_v39 = vpop.permute.xlu1 %1109 }
 0x165   : > { %1139 = vst.msk [vmem:[#allocation2 + $0x68] sm:$0xff] %vm1125_vm9, %v1110_v39 }
 0x166   : > { %v1098_v62 = vpop.permute.xlu0 %1097 }
 0x167   : > { %1133 = vst.msk [vmem:[#allocation2 + $0x38] sm:$0xff] %vm1125_vm9, %v1098_v62 }
 0x168   : > { %v1543_v26 = vpop.permute.xlu1 %1542 }
 0x169   : > { %1573 = vst.msk [vmem:[#allocation2 + $0x60] sm:$0xff] %vm1560_vm10, %v1543_v26 }
 0x16a   : > { %v1531_v32 = vpop.permute.xlu0 %1530 }
 0x16b   : > { %1567 = vst.msk [vmem:[#allocation2 + $0x30] sm:$0xff] %vm1560_vm10, %v1531_v32 }
 0x16c   : > { %v1545_v30 = vpop.permute.xlu1 %1544 }
 0x16d   : > { %1574 = vst.msk [vmem:[#allocation2 + $0x68] sm:$0xff] %vm1560_vm10, %v1545_v30 }
 0x170   : > { %v1754_v20 = vpop.permute.xlu1 %1753 }
 0x171   : > { %1784 = vst.msk [vmem:[#allocation2 + $0x60] sm:$0xff] %vm1771_vm11, %v1754_v20 }
 0x172   : > { %v1533_v48 = vpop.permute.xlu0 %1532 }
 0x173   : > { %1568 = vst.msk [vmem:[#allocation2 + $0x38] sm:$0xff] %vm1560_vm10, %v1533_v48 }
 0x174   : > { %v1756_v55 = vpop.permute.xlu1 %1755 }
 0x175   : > { %1785 = vst.msk [vmem:[#allocation2 + $0x68] sm:$0xff] %vm1771_vm11, %v1756_v55 }
 0x176   : > { %v1742_v8 = vpop.permute.xlu0 %1741 }
 0x177   : > { %1778 = vst.msk [vmem:[#allocation2 + $0x30] sm:$0xff] %vm1771_vm11, %v1742_v8 }
 0x178   : > { %v1927_v7 = vpop.permute.xlu1 %1926 }
 0x179   : > { %1957 = vst.msk [vmem:[#allocation2 + $0x60] sm:$0xff] %vm1944_vm12, %v1927_v7 }
 0x17a   : > { %v1744_v15 = vpop.permute.xlu0 %1743 }
 0x17b   : > { %1779 = vst.msk [vmem:[#allocation2 + $0x38] sm:$0xff] %vm1771_vm11, %v1744_v15 }
 0x17c   : > { %v1929_v38 = vpop.permute.xlu1 %1928 }
 0x17d   : > { %1958 = vst.msk [vmem:[#allocation2 + $0x68] sm:$0xff] %vm1944_vm12, %v1929_v38 }
 0x17e   : > { %v1915_v41 = vpop.permute.xlu0 %1914 }
 0x17f   : > { %1951 = vst.msk [vmem:[#allocation2 + $0x30] sm:$0xff] %vm1944_vm12, %v1915_v41 }
 0x180   : > { %v2362_v11 = vpop.permute.xlu1 %2361 }
 0x181   : > { %2392 = vst.msk [vmem:[#allocation2 + $0x60] sm:$0xff] %vm2379_vm13, %v2362_v11 }
 0x182   : > { %v1917_v33 = vpop.permute.xlu0 %1916 }
 0x183   : > { %1952 = vst.msk [vmem:[#allocation2 + $0x38] sm:$0xff] %vm1944_vm12, %v1917_v33 }
 0x185   : > { %v2364_v3 = vpop.permute.xlu1 %2363 }
 0x186   : > { %v2350_v52 = vpop.permute.xlu0 %2349  ;;  %2393 = vst.msk [vmem:[#allocation2 + $0x68] sm:$0xff] %vm2379_vm13, %v2364_v3 }
 0x187   : > { %2386 = vst.msk [vmem:[#allocation2 + $0x30] sm:$0xff] %vm2379_vm13, %v2350_v52 }
 0x189   : > { %v2573_v45 = vpop.permute.xlu1 %2572 }
 0x18a   : > { %v2352_v50 = vpop.permute.xlu0 %2351  ;;  %2603 = vst.msk [vmem:[#allocation2 + $0x60] sm:$0xff] %vm2590_vm14, %v2573_v45 }
 0x18b   : > { %2387 = vst.msk [vmem:[#allocation2 + $0x38] sm:$0xff] %vm2379_vm13, %v2352_v50 }
 0x18d   : > { %v2575_v29 = vpop.permute.xlu1 %2574 }
 0x18e   : > { %v2561_v59 = vpop.permute.xlu0 %2560  ;;  %2604 = vst.msk [vmem:[#allocation2 + $0x68] sm:$0xff] %vm2590_vm14, %v2575_v29 }
 0x18f   : > { %2597 = vst.msk [vmem:[#allocation2 + $0x30] sm:$0xff] %vm2590_vm14, %v2561_v59 }
 0x191   : > { %v2617_v58 = vld [vmem:[#allocation2 + $0x60] sm:$0xff] }
 0x192   : > { %v2563_v10 = vpop.permute.xlu0 %2562  ;;  %3282 = vmatprep.mubr.msk.bf16.mxu1 %vm2639_vm0, %v2617_v58 }
 0x193   : > { %2598 = vst.msk [vmem:[#allocation2 + $0x38] sm:$0xff] %vm2590_vm14, %v2563_v10 }
 0x195   : > { %v2618_v24 = vld [vmem:[#allocation2 + $0x68] sm:$0xff] }
 0x196   : > { %v2611_v54 = vld [vmem:[#allocation2 + $0x30] sm:$0xff]  ;;  %3283 = vmatmul.mubr.msk.bf16.gmra.mrb[8].mxu1 %vm2639_vm0, %v2618_v24 }
 0x197   : > { %3270 = vmatprep.mubr.msk.bf16.mxu0 %vm2639_vm0, %v2611_v54 }
 0x19a   : > { %v2612_v12 = vld [vmem:[#allocation2 + $0x38] sm:$0xff] }
 0x19b   : > { %3271 = vmatmul.mubr.msk.bf16.gmra.mrb[12].mxu0 %vm2639_vm0, %v2612_v12  ;;  %v3260_v34 = vpop.f32.mrb[0].mxu0 }
 0x19c   : > { %2834 = vst.msk [vmem:[%s4942_s6 + $0x10] sm:$0xff] %vm2831_vm1, %v3260_v34  ;;  %v2720_v27 = vpop.f32.mrb[1].mxu0 }
 0x19d   : > { %2832 = vst.msk [vmem:[%s4942_s6] sm:$0xff] %vm2831_vm1, %v2720_v27  ;;  %v3261_v60 = vpop.f32.mrb[2].mxu0 }
 0x19e   : > { %2835 = vst.msk [vmem:[%s4942_s6 + $0x18] sm:$0xff] %vm2831_vm1, %v3261_v60  ;;  %v2723_v63 = vpop.f32.mrb[3].mxu0 }
 0x19f   : > { %2833 = vst.msk [vmem:[%s4942_s6 + $0x8] sm:$0xff] %vm2831_vm1, %v2723_v63 }
 0x1db   : > { %v3276_v22 = vpop.f32.mrb[0].mxu1 }
 0x1dc   : > { %2850 = vst.msk [vmem:[%s4942_s6 + $0x90] sm:$0xff] %vm2831_vm1, %v3276_v22  ;;  %v2784_v14 = vpop.f32.mrb[1].mxu1 }
 0x1dd   : > { %2848 = vst.msk [vmem:[%s4942_s6 + $0x80] sm:$0xff] %vm2831_vm1, %v2784_v14  ;;  %v3277_v21 = vpop.f32.mrb[2].mxu1 }
 0x1de   : > { %v3264_v44 = vpop.f32.mrb[4].mxu0  ;;  %2851 = vst.msk [vmem:[%s4942_s6 + $0x98] sm:$0xff] %vm2831_vm1, %v3277_v21  ;;  %v2787_v35 = vpop.f32.mrb[3].mxu1 }
 0x1df   : > { %2838 = vst.msk [vmem:[%s4942_s6 + $0x30] sm:$0xff] %vm2831_vm1, %v3264_v44  ;;  %v2736_v46 = vpop.f32.mrb[5].mxu0  ;;  %2849 = vst.msk [vmem:[%s4942_s6 + $0x88] sm:$0xff] %vm2831_vm1, %v2787_v35 }
 0x1e0   : > { %2836 = vst.msk [vmem:[%s4942_s6 + $0x20] sm:$0xff] %vm2831_vm1, %v2736_v46  ;;  %v3265_v2 = vpop.f32.mrb[6].mxu0 }
 0x1e1   : > { %2839 = vst.msk [vmem:[%s4942_s6 + $0x38] sm:$0xff] %vm2831_vm1, %v3265_v2  ;;  %v2739_v53 = vpop.f32.mrb[7].mxu0 }
 0x1e2   : > { %2837 = vst.msk [vmem:[%s4942_s6 + $0x28] sm:$0xff] %vm2831_vm1, %v2739_v53 }
 0x227   : > { %v3280_v57 = vpop.f32.mrb[4].mxu1 }
 0x228   : > { %2854 = vst.msk [vmem:[%s4942_s6 + $0xb0] sm:$0xff] %vm2831_vm1, %v3280_v57  ;;  %v2800_v42 = vpop.f32.mrb[5].mxu1 }
 0x229   : > { %2852 = vst.msk [vmem:[%s4942_s6 + $0xa0] sm:$0xff] %vm2831_vm1, %v2800_v42  ;;  %v3281_v25 = vpop.f32.mrb[6].mxu1 }
 0x22a   : > { %v3268_v28 = vpop.f32.mrb[8].mxu0  ;;  %2855 = vst.msk [vmem:[%s4942_s6 + $0xb8] sm:$0xff] %vm2831_vm1, %v3281_v25  ;;  %v2803_v4 = vpop.f32.mrb[7].mxu1 }
 0x22b   : > { %2842 = vst.msk [vmem:[%s4942_s6 + $0x50] sm:$0xff] %vm2831_vm1, %v3268_v28  ;;  %v2752_v23 = vpop.f32.mrb[9].mxu0  ;;  %2853 = vst.msk [vmem:[%s4942_s6 + $0xa8] sm:$0xff] %vm2831_vm1, %v2803_v4 }
 0x22c   : > { %2840 = vst.msk [vmem:[%s4942_s6 + $0x40] sm:$0xff] %vm2831_vm1, %v2752_v23  ;;  %v3269_v19 = vpop.f32.mrb[10].mxu0 }
 0x22d   : > { %2843 = vst.msk [vmem:[%s4942_s6 + $0x58] sm:$0xff] %vm2831_vm1, %v3269_v19  ;;  %v2755_v47 = vpop.f32.mrb[11].mxu0 }
 0x22e   : > { %2841 = vst.msk [vmem:[%s4942_s6 + $0x48] sm:$0xff] %vm2831_vm1, %v2755_v47 }
 0x269   : > { %v3284_v43 = vpop.f32.mrb[8].mxu1 }
 0x26a   : > { %2858 = vst.msk [vmem:[%s4942_s6 + $0xd0] sm:$0xff] %vm2831_vm1, %v3284_v43  ;;  %v2816_v0 = vpop.f32.mrb[9].mxu1 }
 0x26b   : > { %2856 = vst.msk [vmem:[%s4942_s6 + $0xc0] sm:$0xff] %vm2831_vm1, %v2816_v0  ;;  %v3285_v31 = vpop.f32.mrb[10].mxu1 }
 0x26c   : > { %2859 = vst.msk [vmem:[%s4942_s6 + $0xd8] sm:$0xff] %vm2831_vm1, %v3285_v31  ;;  %v2819_v6 = vpop.f32.mrb[11].mxu1 }
 0x26d   : > { %2857 = vst.msk [vmem:[%s4942_s6 + $0xc8] sm:$0xff] %vm2831_vm1, %v2819_v6 }
 0x26e   : > { %v3272_v36 = vpop.f32.mrb[12].mxu0 }
 0x26f   : > { %2846 = vst.msk [vmem:[%s4942_s6 + $0x70] sm:$0xff] %vm2831_vm1, %v3272_v36  ;;  %v2768_v40 = vpop.f32.mrb[13].mxu0 }
 0x270   : > { %2844 = vst.msk [vmem:[%s4942_s6 + $0x60] sm:$0xff] %vm2831_vm1, %v2768_v40  ;;  %v3273_v56 = vpop.f32.mrb[14].mxu0 }
 0x271   : > { %2847 = vst.msk [vmem:[%s4942_s6 + $0x78] sm:$0xff] %vm2831_vm1, %v3273_v56  ;;  %v2771_v61 = vpop.f32.mrb[15].mxu0 }
 0x272   : > { %2845 = vst.msk [vmem:[%s4942_s6 + $0x68] sm:$0xff] %vm2831_vm1, %v2771_v61 }
 0x273 PF: > { %s12_s11 = sadd.s32 1, %s3402_s11   ;;  %s5017_s9 = smov %s3398_s10 }
 0x274   : > { %p9_p5 = scmp.ge.s32.totalorder %s12_s11, 4   ;;  %s5018_s10 = smov %s5020_s12 }
 0x276   :  { %11 = sbr.rel (!%p9_p5) target bundleno = 2 (0x2), region = 61 }

</bundles_post_ra>
